<compile_context>
chip_gen: v5e
topology: v5e:2x2
jax: 0.10.0
libtpu: 0.0.40
codegen_flags: <defaults>
</compile_context>

<pallas_src>
import math

import jax
import jax.numpy as jnp
import numpy as np
from jax import lax
from jax.experimental import pallas as pl
from jax.experimental.pallas import tpu as pltpu

# ---------------- model hyper-parameters (small, consistent with the module) ----------
BATCH = 2
SEQ = 8
EMBED_DIM = 32
NUM_HEADS = 4
HEAD_DIM = EMBED_DIM // NUM_HEADS
HIDDEN_DIM = 64
VOCAB = 64
VOCAB_PAD = 128            # lane-dense logits store (multiple of 128); sliced to VOCAB outside
NUM_LAYERS = 2
EPS = 1e-6
MASK_VALUE = -0.7 * float(np.finfo(np.float32).max)


def _rmsnorm(x, scale, eps=EPS):
    ms = jnp.mean(x * x, axis=-1, keepdims=True)
    return x * lax.rsqrt(ms + eps) * scale


# ---------------- fused Pallas kernel: all layers + final norm + tied projection -------
def make_decoder_kernel(num_layers, num_heads, head_dim):
    sm_scale = 1.0 / math.sqrt(head_dim)
    qkv_blk = 3 * head_dim

    def kernel(h0_ref, mask_ref, scales_ref, wqkv_ref, wo_ref, w1_ref, w3_ref, w2_ref,
               embt_ref, out_ref):
        # mask: 1.0 = attend, 0.0 = masked; (N, N) block-diagonal causal over B*S rows.
        attend = mask_ref[...] > 0.5                        # (N, N) bool
        h = h0_ref[...]                                     # (N, D), N = B*S folded rows

        def layer_step(l, h):
            xn = _rmsnorm(h, scales_ref[2 * l])             # sa_norm, scale (1, D)

            # Fused QKV projection: single (N,D)@(D,3D) MXU push.  Weight columns are
            # laid out head-major ([q_h | k_h | v_h] per head), so the head retile is
            # H contiguous slices + one stack (no 3H width-hd lane slices, no concat).
            qkv = jnp.dot(xn, wqkv_ref[l],
                          preferred_element_type=jnp.float32)          # (N, 3D)
            per_head = jnp.stack(
                [qkv[:, hh * qkv_blk:(hh + 1) * qkv_blk] for hh in range(num_heads)],
                axis=0)                                     # (H, N, 3*hd)
            q = per_head[..., :head_dim]
            k = per_head[..., head_dim:2 * head_dim]
            v = per_head[..., 2 * head_dim:]

            # Head-batched attention over the flattened (B*S) rows.
            s = jnp.einsum('hqd,hkd->hqk', q, k,
                           preferred_element_type=jnp.float32) * sm_scale
            s = jnp.where(attend[None], s, MASK_VALUE)
            m = jnp.max(s, axis=-1, keepdims=True)
            e = jnp.exp(s - m)
            p = e / jnp.sum(e, axis=-1, keepdims=True)      # exact softmax
            ctx = jnp.einsum('hqk,hkd->hqd', p, v,
                             preferred_element_type=jnp.float32)        # (H, N, hd)

            # Output projection with the head merge folded in (wo_ref[l] is the
            # host-reshaped (H, hd, D) view of Wo) -> no per-head concatenate.
            attn = jnp.einsum('hnd,hde->hne', ctx, wo_ref[l],
                              preferred_element_type=jnp.float32)       # (H, N, D)
            h1 = h + jnp.sum(attn, axis=0)                  # residual 1

            # SwiGLU MLP: separate lane-aligned gate/up matmuls, then down projection.
            xn2 = _rmsnorm(h1, scales_ref[2 * l + 1])       # mlp_norm
            g = jnp.dot(xn2, w1_ref[l], preferred_element_type=jnp.float32)
            u = jnp.dot(xn2, w3_ref[l], preferred_element_type=jnp.float32)
            mlp = jnp.dot(jax.nn.silu(g) * u, w2_ref[l],
                          preferred_element_type=jnp.float32)
            return h1 + mlp                                 # residual 2

        h = lax.fori_loop(0, num_layers, layer_step, h, unroll=True)

        # Final RMSNorm + tied-embedding output projection (lane-dense padded vocab).
        hn = _rmsnorm(h, scales_ref[2 * num_layers])
        out_ref[...] = jnp.dot(hn, embt_ref[...], preferred_element_type=jnp.float32)

    return kernel


# ---------------- pallas_call wrapper ---------------------------------------------------
def tied_embedding_transformer_decoder(tokens, packed):
    """tokens: (B, S) int32 -> logits (B, S, VOCAB) float32."""
    B, S = tokens.shape
    D = EMBED_DIM
    N = B * S

    # Embedding gather (XLA glue) + batch folded into the matmul M dimension.
    h0 = jnp.take(packed["emb"], tokens, axis=0).reshape(N, D)

    # Block-diagonal causal mask over the flattened (B*S) rows, built on the host.
    # TODO(synk): a user-supplied (B, S, S) boolean mask would be block-diagonalised
    #             here the same way; only the default causal path is implemented.
    causal = np.tril(np.ones((S, S), np.float32))
    mask_np = np.zeros((N, N), np.float32)
    for b in range(B):
        mask_np[b * S:(b + 1) * S, b * S:(b + 1) * S] = causal
    mask = jnp.asarray(mask_np)

    kernel = make_decoder_kernel(NUM_LAYERS, NUM_HEADS, HEAD_DIM)

    def full(shape):
        return pl.BlockSpec(shape, lambda i, _n=len(shape): (0,) * _n)

    out_padded = pl.pallas_call(
        kernel,
        out_shape=jax.ShapeDtypeStruct((N, VOCAB_PAD), jnp.float32),
        grid=(1,),
        in_specs=[
            full((N, D)),                                   # folded token embeddings
            full((N, N)),                                   # block-diag causal mask
            full((2 * NUM_LAYERS + 1, 1, D)),               # packed norm scales
            full((NUM_LAYERS, D, 3 * D)),                   # fused head-major QKV weights
            full((NUM_LAYERS, NUM_HEADS, HEAD_DIM, D)),     # Wo as per-head row blocks
            full((NUM_LAYERS, D, HIDDEN_DIM)),              # W1 (gate)
            full((NUM_LAYERS, D, HIDDEN_DIM)),              # W3 (up)
            full((NUM_LAYERS, HIDDEN_DIM, D)),              # W2 (down)
            full((D, VOCAB_PAD)),                           # tied emb^T, lane-padded
        ],
        out_specs=full((N, VOCAB_PAD)),
        compiler_params=pltpu.CompilerParams(
            dimension_semantics=("arbitrary",)),
    )(h0, mask, packed["scales"], packed["wqkv"], packed["wo_h"], packed["w1"],
      packed["w3"], packed["w2"], packed["embt_pad"])

    return out_padded[:, :VOCAB].reshape(B, S, VOCAB)


# ---------------- deterministic parameter init + host-side packing ---------------------
def init_params(key):
    keys = jax.random.split(key, NUM_LAYERS + 2)
    emb = jax.random.normal(keys[0], (VOCAB, EMBED_DIM), jnp.float32) * 0.02
    layers = []
    for li in range(NUM_LAYERS):
        lk = jax.random.split(keys[1 + li], 9)
        layers.append(dict(
            wq=jax.random.normal(lk[0], (EMBED_DIM, EMBED_DIM), jnp.float32) * 0.02,
            wk=jax.random.normal(lk[1], (EMBED_DIM, EMBED_DIM), jnp.float32) * 0.02,
            wv=jax.random.normal(lk[2], (EMBED_DIM, EMBED_DIM), jnp.float32) * 0.02,
            wo=jax.random.normal(lk[3], (EMBED_DIM, EMBED_DIM), jnp.float32) * 0.02,
            w1=jax.random.normal(lk[4], (EMBED_DIM, HIDDEN_DIM), jnp.float32) * 0.02,
            w3=jax.random.normal(lk[5], (EMBED_DIM, HIDDEN_DIM), jnp.float32) * 0.02,
            w2=jax.random.normal(lk[6], (HIDDEN_DIM, EMBED_DIM), jnp.float32) * 0.02,
            sa_scale=1.0 + 0.1 * jax.random.normal(lk[7], (EMBED_DIM,), jnp.float32),
            mlp_scale=1.0 + 0.1 * jax.random.normal(lk[8], (EMBED_DIM,), jnp.float32),
        ))
    final_scale = 1.0 + 0.1 * jax.random.normal(keys[-1], (EMBED_DIM,), jnp.float32)
    return emb, layers, final_scale


def pack_params(emb, layers, final_scale):
    """Host-side weight re-layout (hoisted out of the hot path)."""
    D, H, hd = EMBED_DIM, NUM_HEADS, HEAD_DIM
    wqkv, wo_h, w1, w3, w2, scales = [], [], [], [], [], []
    for lp in layers:
        # Fused QKV with head-major columns: [q_h | k_h | v_h] per head.
        wqkv.append(jnp.stack([lp["wq"].reshape(D, H, hd),
                               lp["wk"].reshape(D, H, hd),
                               lp["wv"].reshape(D, H, hd)], axis=2).reshape(D, 3 * D))
        wo_h.append(lp["wo"].reshape(H, hd, D))             # per-head row blocks of Wo
        w1.append(lp["w1"])
        w3.append(lp["w3"])
        w2.append(lp["w2"])
        scales.append(lp["sa_scale"].reshape(1, D))
        scales.append(lp["mlp_scale"].reshape(1, D))
    scales.append(final_scale.reshape(1, D))

    embt_pad = jnp.zeros((D, VOCAB_PAD), jnp.float32).at[:, :VOCAB].set(emb.T)
    return dict(
        emb=emb,
        scales=jnp.stack(scales),                           # (2L+1, 1, D)
        wqkv=jnp.stack(wqkv),                               # (L, D, 3D)
        wo_h=jnp.stack(wo_h),                               # (L, H, hd, D)
        w1=jnp.stack(w1), w3=jnp.stack(w3), w2=jnp.stack(w2),
        embt_pad=embt_pad,                                  # (D, VOCAB_PAD)
    )


# ---------------- pure-JAX reference (same math, un-packed weights) --------------------
def reference_forward(tokens, emb, layers, final_scale):
    B, S = tokens.shape
    D, H, hd = EMBED_DIM, NUM_HEADS, HEAD_DIM
    h = jnp.take(emb, tokens, axis=0)
    causal = jnp.arange(S)[None, :] <= jnp.arange(S)[:, None]
    sm_scale = 1.0 / math.sqrt(hd)
    for lp in layers:
        xn = _rmsnorm(h, lp["sa_scale"])
        q = (xn @ lp["wq"]).reshape(B, S, H, hd)
        k = (xn @ lp["wk"]).reshape(B, S, H, hd)
        v = (xn @ lp["wv"]).reshape(B, S, H, hd)
        s = jnp.einsum("bqhd,bkhd->bhqk", q, k) * sm_scale
        s = jnp.where(causal[None, None], s, MASK_VALUE)
        p = jax.nn.softmax(s, axis=-1)
        o = jnp.einsum("bhqk,bkhd->bqhd", p, v).reshape(B, S, D)
        h = h + o @ lp["wo"]
        xn2 = _rmsnorm(h, lp["mlp_scale"])
        h = h + (jax.nn.silu(xn2 @ lp["w1"]) * (xn2 @ lp["w3"])) @ lp["w2"]
    hn = _rmsnorm(h, final_scale)
    return (hn @ emb.T).astype(jnp.float32)


if __name__ == "__main__":
    key = jax.random.PRNGKey(0)
    k_tok, k_par = jax.random.split(key)
    tokens = jax.random.randint(k_tok, (BATCH, SEQ), 0, VOCAB, dtype=jnp.int32)

    emb, layers, final_scale = init_params(k_par)
    packed = pack_params(emb, layers, final_scale)

    fwd = jax.jit(tied_embedding_transformer_decoder)
    out = jax.block_until_ready(fwd(tokens, packed))

    ref = reference_forward(tokens, emb, layers, final_scale)
    np.testing.assert_allclose(np.asarray(out), np.asarray(ref), rtol=2e-3, atol=1e-5)
    assert out.shape == (BATCH, SEQ, VOCAB) and out.dtype == jnp.float32

    print("KERNEL_OK")
</pallas_src>

<mosaic_0001>
module attributes {stable_mosaic.version = 11 : i64} {
  func.func @kernel(%arg0: i32, %arg1: memref<16x32xf32, #tpu.memory_space<vmem>>, %arg2: memref<16x16xf32, #tpu.memory_space<vmem>>, %arg3: memref<5x1x32xf32, #tpu.memory_space<vmem>>, %arg4: memref<2x32x96xf32, #tpu.memory_space<vmem>>, %arg5: memref<2x4x8x32xf32, #tpu.memory_space<vmem>>, %arg6: memref<2x32x64xf32, #tpu.memory_space<vmem>>, %arg7: memref<2x32x64xf32, #tpu.memory_space<vmem>>, %arg8: memref<2x64x32xf32, #tpu.memory_space<vmem>>, %arg9: memref<32x128xf32, #tpu.memory_space<vmem>>, %arg10: memref<16x128xf32, #tpu.memory_space<vmem>>) attributes {dimension_semantics = [#tpu.dimension_semantics<arbitrary>], iteration_bounds = array<i64: 1>, scalar_prefetch = 0 : i64, scratch_operands = 0 : i64, tpu.core_type = #tpu.core_type<tc>, window_params = [{pipeline_mode = #tpu.pipeline_mode<synchronous>, transform_indices = @transform_0, window_bounds = array<i64: 16, 32>}, {pipeline_mode = #tpu.pipeline_mode<synchronous>, transform_indices = @transform_1, window_bounds = array<i64: 16, 16>}, {pipeline_mode = #tpu.pipeline_mode<synchronous>, transform_indices = @transform_2, window_bounds = array<i64: 5, 1, 32>}, {pipeline_mode = #tpu.pipeline_mode<synchronous>, transform_indices = @transform_3, window_bounds = array<i64: 2, 32, 96>}, {pipeline_mode = #tpu.pipeline_mode<synchronous>, transform_indices = @transform_4, window_bounds = array<i64: 2, 4, 8, 32>}, {pipeline_mode = #tpu.pipeline_mode<synchronous>, transform_indices = @transform_5, window_bounds = array<i64: 2, 32, 64>}, {pipeline_mode = #tpu.pipeline_mode<synchronous>, transform_indices = @transform_6, window_bounds = array<i64: 2, 32, 64>}, {pipeline_mode = #tpu.pipeline_mode<synchronous>, transform_indices = @transform_7, window_bounds = array<i64: 2, 64, 32>}, {pipeline_mode = #tpu.pipeline_mode<synchronous>, transform_indices = @transform_8, window_bounds = array<i64: 32, 128>}, {pipeline_mode = #tpu.pipeline_mode<synchronous>, transform_indices = @transform_9, window_bounds = array<i64: 16, 128>}]} {
    %c0 = arith.constant 0 : index
    %c0_0 = arith.constant 0 : index
    %0 = vector.load %arg2[%c0, %c0_0] : memref<16x16xf32, #tpu.memory_space<vmem>>, vector<16x16xf32>
    %cst = arith.constant 5.000000e-01 : f32
    %1 = vector.broadcast %cst : f32 to vector<16x16xf32>
    %2 = arith.cmpf ogt, %0, %1 : vector<16x16xf32>
    %c0_1 = arith.constant 0 : index
    %c0_2 = arith.constant 0 : index
    %3 = vector.load %arg1[%c0_1, %c0_2] : memref<16x32xf32, #tpu.memory_space<vmem>>, vector<16x32xf32>
    %c0_i32 = arith.constant 0 : i32
    %c2_i32 = arith.constant 2 : i32
    %4 = arith.muli %c2_i32, %c0_i32 : i32
    %5 = arith.index_cast %4 : i32 to index
    %c0_3 = arith.constant 0 : index
    %c0_4 = arith.constant 0 : index
    %6 = vector.load %arg3[%5, %c0_3, %c0_4] : memref<5x1x32xf32, #tpu.memory_space<vmem>>, vector<1x1x32xf32>
    %7 = vector.shape_cast %6 : vector<1x1x32xf32> to vector<1x32xf32>
    %8 = arith.mulf %3, %3 : vector<16x32xf32>
    %cst_5 = arith.constant dense<0.000000e+00> : vector<16xf32>
    %9 = vector.multi_reduction <add>, %8, %cst_5 [1] : vector<16x32xf32> to vector<16xf32>
    %10 = vector.shape_cast %9 : vector<16xf32> to vector<16x1xf32>
    %cst_6 = arith.constant 3.200000e+01 : f32
    %11 = vector.broadcast %cst_6 : f32 to vector<16x1xf32>
    %12 = arith.divf %10, %11 : vector<16x1xf32>
    %cst_7 = arith.constant 9.99999997E-7 : f32
    %13 = vector.broadcast %cst_7 : f32 to vector<16x1xf32>
    %14 = arith.addf %12, %13 : vector<16x1xf32>
    %15 = math.rsqrt %14 : vector<16x1xf32>
    %16 = vector.broadcast %15 : vector<16x1xf32> to vector<16x32xf32>
    %17 = arith.mulf %3, %16 : vector<16x32xf32>
    %18 = vector.broadcast %7 : vector<1x32xf32> to vector<16x32xf32>
    %19 = arith.mulf %17, %18 : vector<16x32xf32>
    %20 = arith.index_cast %c0_i32 : i32 to index
    %c0_8 = arith.constant 0 : index
    %c0_9 = arith.constant 0 : index
    %21 = vector.load %arg4[%20, %c0_8, %c0_9] : memref<2x32x96xf32, #tpu.memory_space<vmem>>, vector<1x32x96xf32>
    %22 = vector.shape_cast %21 : vector<1x32x96xf32> to vector<32x96xf32>
    %cst_10 = arith.constant dense<0.000000e+00> : vector<16x96xf32>
    %23 = tpu.matmul %19, %22, %cst_10 {dimension_numbers = #tpu.dot_dimension_numbers<[1], [0], [0], [1], [0, 0, 1, 1], [], []>} : vector<16x32xf32>, vector<32x96xf32>, vector<16x96xf32> -> vector<16x96xf32>
    %24 = vector.extract_strided_slice %23 {offsets = [0, 0], sizes = [16, 24], strides = [1, 1]} : vector<16x96xf32> to vector<16x24xf32>
    %25 = vector.extract_strided_slice %23 {offsets = [0, 24], sizes = [16, 24], strides = [1, 1]} : vector<16x96xf32> to vector<16x24xf32>
    %26 = vector.extract_strided_slice %23 {offsets = [0, 48], sizes = [16, 24], strides = [1, 1]} : vector<16x96xf32> to vector<16x24xf32>
    %27 = vector.extract_strided_slice %23 {offsets = [0, 72], sizes = [16, 24], strides = [1, 1]} : vector<16x96xf32> to vector<16x24xf32>
    %28 = vector.shape_cast %24 : vector<16x24xf32> to vector<1x16x24xf32>
    %29 = vector.shape_cast %25 : vector<16x24xf32> to vector<1x16x24xf32>
    %30 = vector.shape_cast %26 : vector<16x24xf32> to vector<1x16x24xf32>
    %31 = vector.shape_cast %27 : vector<16x24xf32> to vector<1x16x24xf32>
    %32 = tpu.concatenate %28, %29, %30, %31 in 0 : vector<1x16x24xf32>, vector<1x16x24xf32>, vector<1x16x24xf32>, vector<1x16x24xf32> -> vector<4x16x24xf32>
    %33 = vector.extract_strided_slice %32 {offsets = [0, 0, 0], sizes = [4, 16, 8], strides = [1, 1, 1]} : vector<4x16x24xf32> to vector<4x16x8xf32>
    %34 = vector.extract_strided_slice %32 {offsets = [0, 0, 8], sizes = [4, 16, 8], strides = [1, 1, 1]} : vector<4x16x24xf32> to vector<4x16x8xf32>
    %35 = vector.extract_strided_slice %32 {offsets = [0, 0, 16], sizes = [4, 16, 8], strides = [1, 1, 1]} : vector<4x16x24xf32> to vector<4x16x8xf32>
    "tpu.trace_start"() <{level = 10 : i32, message = "hqd,hkd->hqk"}> : () -> ()
    %cst_11 = arith.constant dense<0.000000e+00> : vector<4x16x16xf32>
    %36 = tpu.matmul %33, %34, %cst_11 {dimension_numbers = #tpu.dot_dimension_numbers<[2], [2], [1], [1], [0, 0, 0, 1, 1, 1], [0], [0]>} : vector<4x16x8xf32>, vector<4x16x8xf32>, vector<4x16x16xf32> -> vector<4x16x16xf32>
    "tpu.trace_stop"() : () -> ()
    %cst_12 = arith.constant 0.353553385 : f32
    %37 = vector.broadcast %cst_12 : f32 to vector<4x16x16xf32>
    %38 = arith.mulf %36, %37 : vector<4x16x16xf32>
    %39 = vector.shape_cast %2 : vector<16x16xi1> to vector<1x16x16xi1>
    %cst_13 = arith.constant -2.38197633E+38 : f32
    %40 = vector.shape_cast %39 : vector<1x16x16xi1> to vector<1x16x16xi1>
    %41 = vector.broadcast %40 : vector<1x16x16xi1> to vector<4x16x16xi1>
    %42 = vector.broadcast %cst_13 : f32 to vector<4x16x16xf32>
    %43 = arith.select %41, %38, %42 : vector<4x16x16xi1>, vector<4x16x16xf32>
    %cst_14 = arith.constant dense<0xFF800000> : vector<4x16xf32>
    %44 = vector.multi_reduction <maximumf>, %43, %cst_14 [2] : vector<4x16x16xf32> to vector<4x16xf32>
    %45 = vector.shape_cast %44 : vector<4x16xf32> to vector<4x16x1xf32>
    %46 = vector.broadcast %45 : vector<4x16x1xf32> to vector<4x16x16xf32>
    %47 = arith.subf %43, %46 : vector<4x16x16xf32>
    %48 = math.exp %47 : vector<4x16x16xf32>
    %cst_15 = arith.constant dense<0.000000e+00> : vector<4x16xf32>
    %49 = vector.multi_reduction <add>, %48, %cst_15 [2] : vector<4x16x16xf32> to vector<4x16xf32>
    %50 = vector.shape_cast %49 : vector<4x16xf32> to vector<4x16x1xf32>
    %51 = vector.broadcast %50 : vector<4x16x1xf32> to vector<4x16x16xf32>
    %52 = arith.divf %48, %51 : vector<4x16x16xf32>
    "tpu.trace_start"() <{level = 10 : i32, message = "hqk,hkd->hqd"}> : () -> ()
    %cst_16 = arith.constant dense<0.000000e+00> : vector<4x16x8xf32>
    %53 = tpu.matmul %52, %35, %cst_16 {dimension_numbers = #tpu.dot_dimension_numbers<[2], [1], [1], [2], [0, 0, 0, 1, 1, 2], [0], [0]>} : vector<4x16x16xf32>, vector<4x16x8xf32>, vector<4x16x8xf32> -> vector<4x16x8xf32>
    "tpu.trace_stop"() : () -> ()
    %54 = arith.index_cast %c0_i32 : i32 to index
    %c0_17 = arith.constant 0 : index
    %c0_18 = arith.constant 0 : index
    %c0_19 = arith.constant 0 : index
    %55 = vector.load %arg5[%54, %c0_17, %c0_18, %c0_19] : memref<2x4x8x32xf32, #tpu.memory_space<vmem>>, vector<1x4x8x32xf32>
    %56 = vector.shape_cast %55 : vector<1x4x8x32xf32> to vector<4x8x32xf32>
    "tpu.trace_start"() <{level = 10 : i32, message = "hnd,hde->hne"}> : () -> ()
    %cst_20 = arith.constant dense<0.000000e+00> : vector<4x16x32xf32>
    %57 = tpu.matmul %53, %56, %cst_20 {dimension_numbers = #tpu.dot_dimension_numbers<[2], [1], [1], [2], [0, 0, 0, 1, 1, 2], [0], [0]>} : vector<4x16x8xf32>, vector<4x8x32xf32>, vector<4x16x32xf32> -> vector<4x16x32xf32>
    "tpu.trace_stop"() : () -> ()
    %cst_21 = arith.constant dense<0.000000e+00> : vector<16x32xf32>
    %58 = vector.multi_reduction <add>, %57, %cst_21 [0] : vector<4x16x32xf32> to vector<16x32xf32>
    %59 = arith.addf %3, %58 : vector<16x32xf32>
    %c2_i32_22 = arith.constant 2 : i32
    %60 = arith.muli %c2_i32_22, %c0_i32 : i32
    %c1_i32 = arith.constant 1 : i32
    %61 = arith.addi %60, %c1_i32 : i32
    %62 = arith.index_cast %61 : i32 to index
    %c0_23 = arith.constant 0 : index
    %c0_24 = arith.constant 0 : index
    %63 = vector.load %arg3[%62, %c0_23, %c0_24] : memref<5x1x32xf32, #tpu.memory_space<vmem>>, vector<1x1x32xf32>
    %64 = vector.shape_cast %63 : vector<1x1x32xf32> to vector<1x32xf32>
    %65 = arith.mulf %59, %59 : vector<16x32xf32>
    %cst_25 = arith.constant dense<0.000000e+00> : vector<16xf32>
    %66 = vector.multi_reduction <add>, %65, %cst_25 [1] : vector<16x32xf32> to vector<16xf32>
    %67 = vector.shape_cast %66 : vector<16xf32> to vector<16x1xf32>
    %cst_26 = arith.constant 3.200000e+01 : f32
    %68 = vector.broadcast %cst_26 : f32 to vector<16x1xf32>
    %69 = arith.divf %67, %68 : vector<16x1xf32>
    %cst_27 = arith.constant 9.99999997E-7 : f32
    %70 = vector.broadcast %cst_27 : f32 to vector<16x1xf32>
    %71 = arith.addf %69, %70 : vector<16x1xf32>
    %72 = math.rsqrt %71 : vector<16x1xf32>
    %73 = vector.broadcast %72 : vector<16x1xf32> to vector<16x32xf32>
    %74 = arith.mulf %59, %73 : vector<16x32xf32>
    %75 = vector.broadcast %64 : vector<1x32xf32> to vector<16x32xf32>
    %76 = arith.mulf %74, %75 : vector<16x32xf32>
    %77 = arith.index_cast %c0_i32 : i32 to index
    %c0_28 = arith.constant 0 : index
    %c0_29 = arith.constant 0 : index
    %78 = vector.load %arg6[%77, %c0_28, %c0_29] : memref<2x32x64xf32, #tpu.memory_space<vmem>>, vector<1x32x64xf32>
    %79 = vector.shape_cast %78 : vector<1x32x64xf32> to vector<32x64xf32>
    %cst_30 = arith.constant dense<0.000000e+00> : vector<16x64xf32>
    %80 = tpu.matmul %76, %79, %cst_30 {dimension_numbers = #tpu.dot_dimension_numbers<[1], [0], [0], [1], [0, 0, 1, 1], [], []>} : vector<16x32xf32>, vector<32x64xf32>, vector<16x64xf32> -> vector<16x64xf32>
    %81 = arith.index_cast %c0_i32 : i32 to index
    %c0_31 = arith.constant 0 : index
    %c0_32 = arith.constant 0 : index
    %82 = vector.load %arg7[%81, %c0_31, %c0_32] : memref<2x32x64xf32, #tpu.memory_space<vmem>>, vector<1x32x64xf32>
    %83 = vector.shape_cast %82 : vector<1x32x64xf32> to vector<32x64xf32>
    %cst_33 = arith.constant dense<0.000000e+00> : vector<16x64xf32>
    %84 = tpu.matmul %76, %83, %cst_33 {dimension_numbers = #tpu.dot_dimension_numbers<[1], [0], [0], [1], [0, 0, 1, 1], [], []>} : vector<16x32xf32>, vector<32x64xf32>, vector<16x64xf32> -> vector<16x64xf32>
    %85 = arith.negf %80 : vector<16x64xf32>
    %86 = math.exp %85 : vector<16x64xf32>
    %cst_34 = arith.constant 1.000000e+00 : f32
    %87 = vector.broadcast %cst_34 : f32 to vector<16x64xf32>
    %88 = arith.addf %87, %86 : vector<16x64xf32>
    %89 = arith.divf %87, %88 : vector<16x64xf32>
    %90 = arith.mulf %80, %89 : vector<16x64xf32>
    %91 = arith.mulf %90, %84 : vector<16x64xf32>
    %92 = arith.index_cast %c0_i32 : i32 to index
    %c0_35 = arith.constant 0 : index
    %c0_36 = arith.constant 0 : index
    %93 = vector.load %arg8[%92, %c0_35, %c0_36] : memref<2x64x32xf32, #tpu.memory_space<vmem>>, vector<1x64x32xf32>
    %94 = vector.shape_cast %93 : vector<1x64x32xf32> to vector<64x32xf32>
    %cst_37 = arith.constant dense<0.000000e+00> : vector<16x32xf32>
    %95 = tpu.matmul %91, %94, %cst_37 {dimension_numbers = #tpu.dot_dimension_numbers<[1], [0], [0], [1], [0, 0, 1, 1], [], []>} : vector<16x64xf32>, vector<64x32xf32>, vector<16x32xf32> -> vector<16x32xf32>
    %96 = arith.addf %59, %95 : vector<16x32xf32>
    %c1_i32_38 = arith.constant 1 : i32
    %c2_i32_39 = arith.constant 2 : i32
    %97 = arith.muli %c2_i32_39, %c1_i32_38 : i32
    %98 = arith.index_cast %97 : i32 to index
    %c0_40 = arith.constant 0 : index
    %c0_41 = arith.constant 0 : index
    %99 = vector.load %arg3[%98, %c0_40, %c0_41] : memref<5x1x32xf32, #tpu.memory_space<vmem>>, vector<1x1x32xf32>
    %100 = vector.shape_cast %99 : vector<1x1x32xf32> to vector<1x32xf32>
    %101 = arith.mulf %96, %96 : vector<16x32xf32>
    %cst_42 = arith.constant dense<0.000000e+00> : vector<16xf32>
    %102 = vector.multi_reduction <add>, %101, %cst_42 [1] : vector<16x32xf32> to vector<16xf32>
    %103 = vector.shape_cast %102 : vector<16xf32> to vector<16x1xf32>
    %cst_43 = arith.constant 3.200000e+01 : f32
    %104 = vector.broadcast %cst_43 : f32 to vector<16x1xf32>
    %105 = arith.divf %103, %104 : vector<16x1xf32>
    %cst_44 = arith.constant 9.99999997E-7 : f32
    %106 = vector.broadcast %cst_44 : f32 to vector<16x1xf32>
    %107 = arith.addf %105, %106 : vector<16x1xf32>
    %108 = math.rsqrt %107 : vector<16x1xf32>
    %109 = vector.broadcast %108 : vector<16x1xf32> to vector<16x32xf32>
    %110 = arith.mulf %96, %109 : vector<16x32xf32>
    %111 = vector.broadcast %100 : vector<1x32xf32> to vector<16x32xf32>
    %112 = arith.mulf %110, %111 : vector<16x32xf32>
    %113 = arith.index_cast %c1_i32_38 : i32 to index
    %c0_45 = arith.constant 0 : index
    %c0_46 = arith.constant 0 : index
    %114 = vector.load %arg4[%113, %c0_45, %c0_46] : memref<2x32x96xf32, #tpu.memory_space<vmem>>, vector<1x32x96xf32>
    %115 = vector.shape_cast %114 : vector<1x32x96xf32> to vector<32x96xf32>
    %cst_47 = arith.constant dense<0.000000e+00> : vector<16x96xf32>
    %116 = tpu.matmul %112, %115, %cst_47 {dimension_numbers = #tpu.dot_dimension_numbers<[1], [0], [0], [1], [0, 0, 1, 1], [], []>} : vector<16x32xf32>, vector<32x96xf32>, vector<16x96xf32> -> vector<16x96xf32>
    %117 = vector.extract_strided_slice %116 {offsets = [0, 0], sizes = [16, 24], strides = [1, 1]} : vector<16x96xf32> to vector<16x24xf32>
    %118 = vector.extract_strided_slice %116 {offsets = [0, 24], sizes = [16, 24], strides = [1, 1]} : vector<16x96xf32> to vector<16x24xf32>
    %119 = vector.extract_strided_slice %116 {offsets = [0, 48], sizes = [16, 24], strides = [1, 1]} : vector<16x96xf32> to vector<16x24xf32>
    %120 = vector.extract_strided_slice %116 {offsets = [0, 72], sizes = [16, 24], strides = [1, 1]} : vector<16x96xf32> to vector<16x24xf32>
    %121 = vector.shape_cast %117 : vector<16x24xf32> to vector<1x16x24xf32>
    %122 = vector.shape_cast %118 : vector<16x24xf32> to vector<1x16x24xf32>
    %123 = vector.shape_cast %119 : vector<16x24xf32> to vector<1x16x24xf32>
    %124 = vector.shape_cast %120 : vector<16x24xf32> to vector<1x16x24xf32>
    %125 = tpu.concatenate %121, %122, %123, %124 in 0 : vector<1x16x24xf32>, vector<1x16x24xf32>, vector<1x16x24xf32>, vector<1x16x24xf32> -> vector<4x16x24xf32>
    %126 = vector.extract_strided_slice %125 {offsets = [0, 0, 0], sizes = [4, 16, 8], strides = [1, 1, 1]} : vector<4x16x24xf32> to vector<4x16x8xf32>
    %127 = vector.extract_strided_slice %125 {offsets = [0, 0, 8], sizes = [4, 16, 8], strides = [1, 1, 1]} : vector<4x16x24xf32> to vector<4x16x8xf32>
    %128 = vector.extract_strided_slice %125 {offsets = [0, 0, 16], sizes = [4, 16, 8], strides = [1, 1, 1]} : vector<4x16x24xf32> to vector<4x16x8xf32>
    "tpu.trace_start"() <{level = 10 : i32, message = "hqd,hkd->hqk"}> : () -> ()
    %cst_48 = arith.constant dense<0.000000e+00> : vector<4x16x16xf32>
    %129 = tpu.matmul %126, %127, %cst_48 {dimension_numbers = #tpu.dot_dimension_numbers<[2], [2], [1], [1], [0, 0, 0, 1, 1, 1], [0], [0]>} : vector<4x16x8xf32>, vector<4x16x8xf32>, vector<4x16x16xf32> -> vector<4x16x16xf32>
    "tpu.trace_stop"() : () -> ()
    %cst_49 = arith.constant 0.353553385 : f32
    %130 = vector.broadcast %cst_49 : f32 to vector<4x16x16xf32>
    %131 = arith.mulf %129, %130 : vector<4x16x16xf32>
    %132 = vector.shape_cast %2 : vector<16x16xi1> to vector<1x16x16xi1>
    %cst_50 = arith.constant -2.38197633E+38 : f32
    %133 = vector.shape_cast %132 : vector<1x16x16xi1> to vector<1x16x16xi1>
    %134 = vector.broadcast %133 : vector<1x16x16xi1> to vector<4x16x16xi1>
    %135 = vector.broadcast %cst_50 : f32 to vector<4x16x16xf32>
    %136 = arith.select %134, %131, %135 : vector<4x16x16xi1>, vector<4x16x16xf32>
    %cst_51 = arith.constant dense<0xFF800000> : vector<4x16xf32>
    %137 = vector.multi_reduction <maximumf>, %136, %cst_51 [2] : vector<4x16x16xf32> to vector<4x16xf32>
    %138 = vector.shape_cast %137 : vector<4x16xf32> to vector<4x16x1xf32>
    %139 = vector.broadcast %138 : vector<4x16x1xf32> to vector<4x16x16xf32>
    %140 = arith.subf %136, %139 : vector<4x16x16xf32>
    %141 = math.exp %140 : vector<4x16x16xf32>
    %cst_52 = arith.constant dense<0.000000e+00> : vector<4x16xf32>
    %142 = vector.multi_reduction <add>, %141, %cst_52 [2] : vector<4x16x16xf32> to vector<4x16xf32>
    %143 = vector.shape_cast %142 : vector<4x16xf32> to vector<4x16x1xf32>
    %144 = vector.broadcast %143 : vector<4x16x1xf32> to vector<4x16x16xf32>
    %145 = arith.divf %141, %144 : vector<4x16x16xf32>
    "tpu.trace_start"() <{level = 10 : i32, message = "hqk,hkd->hqd"}> : () -> ()
    %cst_53 = arith.constant dense<0.000000e+00> : vector<4x16x8xf32>
    %146 = tpu.matmul %145, %128, %cst_53 {dimension_numbers = #tpu.dot_dimension_numbers<[2], [1], [1], [2], [0, 0, 0, 1, 1, 2], [0], [0]>} : vector<4x16x16xf32>, vector<4x16x8xf32>, vector<4x16x8xf32> -> vector<4x16x8xf32>
    "tpu.trace_stop"() : () -> ()
    %147 = arith.index_cast %c1_i32_38 : i32 to index
    %c0_54 = arith.constant 0 : index
    %c0_55 = arith.constant 0 : index
    %c0_56 = arith.constant 0 : index
    %148 = vector.load %arg5[%147, %c0_54, %c0_55, %c0_56] : memref<2x4x8x32xf32, #tpu.memory_space<vmem>>, vector<1x4x8x32xf32>
    %149 = vector.shape_cast %148 : vector<1x4x8x32xf32> to vector<4x8x32xf32>
    "tpu.trace_start"() <{level = 10 : i32, message = "hnd,hde->hne"}> : () -> ()
    %cst_57 = arith.constant dense<0.000000e+00> : vector<4x16x32xf32>
    %150 = tpu.matmul %146, %149, %cst_57 {dimension_numbers = #tpu.dot_dimension_numbers<[2], [1], [1], [2], [0, 0, 0, 1, 1, 2], [0], [0]>} : vector<4x16x8xf32>, vector<4x8x32xf32>, vector<4x16x32xf32> -> vector<4x16x32xf32>
    "tpu.trace_stop"() : () -> ()
    %cst_58 = arith.constant dense<0.000000e+00> : vector<16x32xf32>
    %151 = vector.multi_reduction <add>, %150, %cst_58 [0] : vector<4x16x32xf32> to vector<16x32xf32>
    %152 = arith.addf %96, %151 : vector<16x32xf32>
    %c2_i32_59 = arith.constant 2 : i32
    %153 = arith.muli %c2_i32_59, %c1_i32_38 : i32
    %c1_i32_60 = arith.constant 1 : i32
    %154 = arith.addi %153, %c1_i32_60 : i32
    %155 = arith.index_cast %154 : i32 to index
    %c0_61 = arith.constant 0 : index
    %c0_62 = arith.constant 0 : index
    %156 = vector.load %arg3[%155, %c0_61, %c0_62] : memref<5x1x32xf32, #tpu.memory_space<vmem>>, vector<1x1x32xf32>
    %157 = vector.shape_cast %156 : vector<1x1x32xf32> to vector<1x32xf32>
    %158 = arith.mulf %152, %152 : vector<16x32xf32>
    %cst_63 = arith.constant dense<0.000000e+00> : vector<16xf32>
    %159 = vector.multi_reduction <add>, %158, %cst_63 [1] : vector<16x32xf32> to vector<16xf32>
    %160 = vector.shape_cast %159 : vector<16xf32> to vector<16x1xf32>
    %cst_64 = arith.constant 3.200000e+01 : f32
    %161 = vector.broadcast %cst_64 : f32 to vector<16x1xf32>
    %162 = arith.divf %160, %161 : vector<16x1xf32>
    %cst_65 = arith.constant 9.99999997E-7 : f32
    %163 = vector.broadcast %cst_65 : f32 to vector<16x1xf32>
    %164 = arith.addf %162, %163 : vector<16x1xf32>
    %165 = math.rsqrt %164 : vector<16x1xf32>
    %166 = vector.broadcast %165 : vector<16x1xf32> to vector<16x32xf32>
    %167 = arith.mulf %152, %166 : vector<16x32xf32>
    %168 = vector.broadcast %157 : vector<1x32xf32> to vector<16x32xf32>
    %169 = arith.mulf %167, %168 : vector<16x32xf32>
    %170 = arith.index_cast %c1_i32_38 : i32 to index
    %c0_66 = arith.constant 0 : index
    %c0_67 = arith.constant 0 : index
    %171 = vector.load %arg6[%170, %c0_66, %c0_67] : memref<2x32x64xf32, #tpu.memory_space<vmem>>, vector<1x32x64xf32>
    %172 = vector.shape_cast %171 : vector<1x32x64xf32> to vector<32x64xf32>
    %cst_68 = arith.constant dense<0.000000e+00> : vector<16x64xf32>
    %173 = tpu.matmul %169, %172, %cst_68 {dimension_numbers = #tpu.dot_dimension_numbers<[1], [0], [0], [1], [0, 0, 1, 1], [], []>} : vector<16x32xf32>, vector<32x64xf32>, vector<16x64xf32> -> vector<16x64xf32>
    %174 = arith.index_cast %c1_i32_38 : i32 to index
    %c0_69 = arith.constant 0 : index
    %c0_70 = arith.constant 0 : index
    %175 = vector.load %arg7[%174, %c0_69, %c0_70] : memref<2x32x64xf32, #tpu.memory_space<vmem>>, vector<1x32x64xf32>
    %176 = vector.shape_cast %175 : vector<1x32x64xf32> to vector<32x64xf32>
    %cst_71 = arith.constant dense<0.000000e+00> : vector<16x64xf32>
    %177 = tpu.matmul %169, %176, %cst_71 {dimension_numbers = #tpu.dot_dimension_numbers<[1], [0], [0], [1], [0, 0, 1, 1], [], []>} : vector<16x32xf32>, vector<32x64xf32>, vector<16x64xf32> -> vector<16x64xf32>
    %178 = arith.negf %173 : vector<16x64xf32>
    %179 = math.exp %178 : vector<16x64xf32>
    %cst_72 = arith.constant 1.000000e+00 : f32
    %180 = vector.broadcast %cst_72 : f32 to vector<16x64xf32>
    %181 = arith.addf %180, %179 : vector<16x64xf32>
    %182 = arith.divf %180, %181 : vector<16x64xf32>
    %183 = arith.mulf %173, %182 : vector<16x64xf32>
    %184 = arith.mulf %183, %177 : vector<16x64xf32>
    %185 = arith.index_cast %c1_i32_38 : i32 to index
    %c0_73 = arith.constant 0 : index
    %c0_74 = arith.constant 0 : index
    %186 = vector.load %arg8[%185, %c0_73, %c0_74] : memref<2x64x32xf32, #tpu.memory_space<vmem>>, vector<1x64x32xf32>
    %187 = vector.shape_cast %186 : vector<1x64x32xf32> to vector<64x32xf32>
    %cst_75 = arith.constant dense<0.000000e+00> : vector<16x32xf32>
    %188 = tpu.matmul %184, %187, %cst_75 {dimension_numbers = #tpu.dot_dimension_numbers<[1], [0], [0], [1], [0, 0, 1, 1], [], []>} : vector<16x64xf32>, vector<64x32xf32>, vector<16x32xf32> -> vector<16x32xf32>
    %189 = arith.addf %152, %188 : vector<16x32xf32>
    %c2_i32_76 = arith.constant 2 : i32
    %c4 = arith.constant 4 : index
    %c0_77 = arith.constant 0 : index
    %c0_78 = arith.constant 0 : index
    %190 = vector.load %arg3[%c4, %c0_77, %c0_78] : memref<5x1x32xf32, #tpu.memory_space<vmem>>, vector<1x1x32xf32>
    %191 = vector.shape_cast %190 : vector<1x1x32xf32> to vector<1x32xf32>
    %192 = arith.mulf %189, %189 : vector<16x32xf32>
    %cst_79 = arith.constant dense<0.000000e+00> : vector<16xf32>
    %193 = vector.multi_reduction <add>, %192, %cst_79 [1] : vector<16x32xf32> to vector<16xf32>
    %194 = vector.shape_cast %193 : vector<16xf32> to vector<16x1xf32>
    %cst_80 = arith.constant 3.200000e+01 : f32
    %195 = vector.broadcast %cst_80 : f32 to vector<16x1xf32>
    %196 = arith.divf %194, %195 : vector<16x1xf32>
    %cst_81 = arith.constant 9.99999997E-7 : f32
    %197 = vector.broadcast %cst_81 : f32 to vector<16x1xf32>
    %198 = arith.addf %196, %197 : vector<16x1xf32>
    %199 = math.rsqrt %198 : vector<16x1xf32>
    %200 = vector.broadcast %199 : vector<16x1xf32> to vector<16x32xf32>
    %201 = arith.mulf %189, %200 : vector<16x32xf32>
    %202 = vector.broadcast %191 : vector<1x32xf32> to vector<16x32xf32>
    %203 = arith.mulf %201, %202 : vector<16x32xf32>
    %c0_82 = arith.constant 0 : index
    %c0_83 = arith.constant 0 : index
    %204 = vector.load %arg9[%c0_82, %c0_83] : memref<32x128xf32, #tpu.memory_space<vmem>>, vector<32x128xf32>
    %cst_84 = arith.constant dense<0.000000e+00> : vector<16x128xf32>
    %205 = tpu.matmul %203, %204, %cst_84 {dimension_numbers = #tpu.dot_dimension_numbers<[1], [0], [0], [1], [0, 0, 1, 1], [], []>} : vector<16x32xf32>, vector<32x128xf32>, vector<16x128xf32> -> vector<16x128xf32>
    %c0_85 = arith.constant 0 : index
    %c0_86 = arith.constant 0 : index
    %206 = vector.load %arg10[%c0_85, %c0_86] : memref<16x128xf32, #tpu.memory_space<vmem>>, vector<16x128xf32>
    tpu.vector_store %arg10[%c0_85, %c0_86], %205 {strides = array<i32>} : memref<16x128xf32, #tpu.memory_space<vmem>>, vector<16x128xf32>,
    return
  }
  func.func @transform_0(%arg0: i32) -> (i32, i32) {
    %c0_i32 = arith.constant 0 : i32
    %c0_i32_0 = arith.constant 0 : i32
    %c0_i32_1 = arith.constant 0 : i32
    return %c0_i32, %c0_i32_0 : i32, i32
  }
  func.func @transform_1(%arg0: i32) -> (i32, i32) {
    %c0_i32 = arith.constant 0 : i32
    %c0_i32_0 = arith.constant 0 : i32
    %c0_i32_1 = arith.constant 0 : i32
    return %c0_i32, %c0_i32_0 : i32, i32
  }
  func.func @transform_2(%arg0: i32) -> (i32, i32, i32) {
    %c0_i32 = arith.constant 0 : i32
    %c0_i32_0 = arith.constant 0 : i32
    %c0_i32_1 = arith.constant 0 : i32
    %c0_i32_2 = arith.constant 0 : i32
    return %c0_i32, %c0_i32_0, %c0_i32_1 : i32, i32, i32
  }
  func.func @transform_3(%arg0: i32) -> (i32, i32, i32) {
    %c0_i32 = arith.constant 0 : i32
    %c0_i32_0 = arith.constant 0 : i32
    %c0_i32_1 = arith.constant 0 : i32
    %c0_i32_2 = arith.constant 0 : i32
    return %c0_i32, %c0_i32_0, %c0_i32_1 : i32, i32, i32
  }
  func.func @transform_4(%arg0: i32) -> (i32, i32, i32, i32) {
    %c0_i32 = arith.constant 0 : i32
    %c0_i32_0 = arith.constant 0 : i32
    %c0_i32_1 = arith.constant 0 : i32
    %c0_i32_2 = arith.constant 0 : i32
    %c0_i32_3 = arith.constant 0 : i32
    return %c0_i32, %c0_i32_0, %c0_i32_1, %c0_i32_2 : i32, i32, i32, i32
  }
  func.func @transform_5(%arg0: i32) -> (i32, i32, i32) {
    %c0_i32 = arith.constant 0 : i32
    %c0_i32_0 = arith.constant 0 : i32
    %c0_i32_1 = arith.constant 0 : i32
    %c0_i32_2 = arith.constant 0 : i32
    return %c0_i32, %c0_i32_0, %c0_i32_1 : i32, i32, i32
  }
  func.func @transform_6(%arg0: i32) -> (i32, i32, i32) {
    %c0_i32 = arith.constant 0 : i32
    %c0_i32_0 = arith.constant 0 : i32
    %c0_i32_1 = arith.constant 0 : i32
    %c0_i32_2 = arith.constant 0 : i32
    return %c0_i32, %c0_i32_0, %c0_i32_1 : i32, i32, i32
  }
  func.func @transform_7(%arg0: i32) -> (i32, i32, i32) {
    %c0_i32 = arith.constant 0 : i32
    %c0_i32_0 = arith.constant 0 : i32
    %c0_i32_1 = arith.constant 0 : i32
    %c0_i32_2 = arith.constant 0 : i32
    return %c0_i32, %c0_i32_0, %c0_i32_1 : i32, i32, i32
  }
  func.func @transform_8(%arg0: i32) -> (i32, i32) {
    %c0_i32 = arith.constant 0 : i32
    %c0_i32_0 = arith.constant 0 : i32
    %c0_i32_1 = arith.constant 0 : i32
    return %c0_i32, %c0_i32_0 : i32, i32
  }
  func.func @transform_9(%arg0: i32) -> (i32, i32) {
    %c0_i32 = arith.constant 0 : i32
    %c0_i32_0 = arith.constant 0 : i32
    %c0_i32_1 = arith.constant 0 : i32
    return %c0_i32, %c0_i32_0 : i32, i32
  }
}

</mosaic_0001>

<bundles_post_ra>
// kernel: tied_embedding_transformer_decoder.1
= control target key start
LH: loop header
LB: loop body
LE: loop exit
PB: predicated region body
PF: predicated region fallthrough
CT: control target
= control target key end

     0   :  { %vm41_vm0 = vcmask 261120   ;;  %v2196_v6 = vmov 32.0   ;;  %s2197_s22 = smov 104   ;;  %s2198_s23 = smov 56   ;;  %vm137_vm8 = vcmask 64512   ;;  %vm294_vm10 = vcmask 130048   ;;  %s3029_s0 = inlined_call_operand.vmem [shape: f32[16,32], index: 0, kind: input, shape index: {}]   ;;  %s3030_s2 = inlined_call_operand.vmem [shape: f32[5,1,32], index: 2, kind: input, shape index: {}]   ;;  %s3031_s3 = inlined_call_operand.vmem [shape: f32[2,32,96], index: 3, kind: input, shape index: {}]   ;;  %s3032_s1 = inlined_call_operand.vmem [shape: f32[16,16], index: 1, kind: input, shape index: {}]   ;;  %s3033_s4 = inlined_call_operand.vmem [shape: f32[2,4,8,32], index: 4, kind: input, shape index: {}]   ;;  %s3034_s5 = inlined_call_operand.vmem [shape: f32[2,32,64], index: 5, kind: input, shape index: {}]   ;;  %s3035_s6 = inlined_call_operand.vmem [shape: f32[2,32,64], index: 6, kind: input, shape index: {}]   ;;  %s3036_s7 = inlined_call_operand.vmem [shape: f32[2,64,32], index: 7, kind: input, shape index: {}]   ;;  %s3037_s8 = inlined_call_operand.vmem [shape: f32[32,128], index: 8, kind: input, shape index: {}]   ;;  %s3038_s9 = inlined_call_operand.vmem [shape: f32[16,128], index: 9, kind: output, shape index: {}]  }
   0x1   :  { %v2255_v0 = vld [vmem:[%s3029_s0 + $0x8] sm:$0xff]  ;;  %v2262_v2 = vld [vmem:[%s3029_s0] sm:$0xff]  ;;  %2094 = vrcp.f32 %v2196_v6  ;;  %v89_v10 = vld [vmem:[%s3031_s3 + $0x18] sm:$0xff]  ;;  %s2199_s24 = smov 80   ;;  %s2200_s25 = smov 120  }
   0x2   :  { %v40_v1 = vmul.f32 %v2255_v0, %v2255_v0  ;;  %v39_v4 = vmul.f32 %v2262_v2, %v2262_v2  ;;  %2039 = vmatpush.msra.mxu1 %v89_v10  ;;  %108 = vmatpush.msra.mxu0 %v89_v10  ;;  %v88_v11 = vld [vmem:[%s3031_s3 + $0x10] sm:$0xff]  ;;  %v87_v13 = vld [vmem:[%s3031_s3 + $0x8] sm:$0xff]  ;;  %v86_v14 = vld [vmem:[%s3031_s3] sm:$0xff] }
   0x3   :  { %v2089_v31 = vld [vmem:[%s3030_s2] ss:$0 sm:$0xff] }
   0x4   :  { %v45_v3 = vsel %vm41_vm0, %v40_v1, 0.0  ;;  %v42_v5 = vsel %vm41_vm0, %v39_v4, 0.0  ;;  %2040 = vmatpush.msra.mxu1 %v88_v11  ;;  %109 = vmatpush.msra.mxu0 %v88_v11  ;;  %v2362_v58 = vld [vmem:[%s3032_s1] sm:$0xff] }
   0x5   :  { %46 = vadd.xlane.f32.xlu0 %v45_v3  ;;  %vm34_vm9 = vcmp.gt.f32.partialorder %v2362_v58, 0.5 }
   0x6   :  { %2041 = vmatpush.msra.mxu1 %v87_v13  ;;  %110 = vmatpush.msra.mxu0 %v87_v13 }
   0x7   :  { %v2095_v7 = vpop.eup %2094 }
   0x8   :  { %v49_v8 = vmul.f32 32.0, %v2095_v7  ;;  %2042 = vmatpush.msra.mxu1 %v86_v14  ;;  %111 = vmatpush.msra.mxu0 %v86_v14  ;;  %vm53_vm1 = vweird.f32 %v2095_v7 }
   0xa   :  { %v50_v9 = vsub.f32 1.0, %v49_v8 }
   0xc   :  { %v51_v12 = vmul.f32 %v2095_v7, %v50_v9 }
   0xd   :  { %43 = vadd.xlane.f32.xlu0 %v42_v5  ;;  %v2373_v5 = vld [vmem:[%s3032_s1 + $0x8] sm:$0xff]  ;;  %s2201_s1 = smov 112  }
   0xe   :  { %v52_v15 = vadd.f32 %v2095_v7, %v51_v12  ;;  %vm35_vm11 = vcmp.gt.f32.partialorder %v2373_v5, 0.5 }
  0x10   :  { %v2280_v16 = vsel %vm53_vm1, %v2095_v7, %v52_v15 }
  0x78   :  { %v47_v17 = vpop.xlane.xlu0 %46 }
  0x79   :  { %v56_v18 = vmul.f32 %v2280_v16, %v47_v17 }
  0x7b   :  { %v58_v19 = vadd.f32 1e-06, %v56_v18 }
  0x7d   :  { %2096 = vrsqrt.f32 %v58_v19  ;;  %vm75_vm3 = vweird.f32 %v58_v19 }
  0x80   :  { %v44_v20 = vpop.xlane.xlu0 %43 }
  0x81   :  { %v55_v21 = vmul.f32 %v2280_v16, %v44_v20 }
  0x83   :  { %v2097_v22 = vpop.eup %2096  ;;  %v57_v23 = vadd.f32 1e-06, %v55_v21 }
  0x84   :  { %v70_v24 = vmul.f32 %v2097_v22, %v58_v19  ;;  %vm76_vm2 = vweird.f32 %v2097_v22 }
  0x85   :  { %2098 = vrsqrt.f32 %v57_v23  ;;  %vm77_vm4 = vmor %vm75_vm3, %vm76_vm2  ;;  %vm65_vm5 = vweird.f32 %v57_v23 }
  0x86   :  { %v71_v25 = vmul.f32 %v2097_v22, %v70_v24 }
  0x88   :  { %v72_v26 = vmul.f32 0.5, %v71_v25 }
  0x8a   :  { %v73_v27 = vsub.f32 1.5, %v72_v26 }
  0x8b   :  { %v2099_v28 = vpop.eup %2098 }
  0x8c   :  { %v74_v29 = vmul.f32 %v2097_v22, %v73_v27  ;;  %v60_v30 = vmul.f32 %v2099_v28, %v57_v23  ;;  %vm66_vm6 = vweird.f32 %v2099_v28 }
  0x8d   :  { %vm67_vm7 = vmor %vm65_vm5, %vm66_vm6 }
  0x8e   :  { %v61_v32 = vmul.f32 %v2099_v28, %v60_v30  ;;  %v78_v33 = vsel %vm77_vm4, %v2097_v22, %v74_v29 }
  0x8f   :  { %v80_v34 = vmul.f32 %v78_v33, %v2255_v0 }
  0x90   :  { %v62_v35 = vmul.f32 0.5, %v61_v32 }
  0x91   :  { %v85_v36 = vmul.f32 %v2089_v31, %v80_v34 }
  0x92   :  { %v63_v37 = vsub.f32 1.5, %v62_v35 }
  0x93   :  { %1926 = vmatmul.msk.f32.vlgmr.msra.gmra.mxu1 %vm41_vm0, %v85_v36 }
  0x94   :  { %v64_v38 = vmul.f32 %v2099_v28, %v63_v37 }
  0x96   :  { %v68_v39 = vsel %vm67_vm7, %v2099_v28, %v64_v38 }
  0x97   :  { %v79_v40 = vmul.f32 %v68_v39, %v2262_v2 }
  0x99   :  { %v84_v41 = vmul.f32 %v2089_v31, %v79_v40 }
  0x9b   :  { %1925 = vmatmul.msk.f32.vlgmr.msra.gmra.mxu0 %vm41_vm0, %v84_v41 }
 0x110   :  { %v2291_v42 = vpop.f32.mrf.mxu1 }
 0x111   :  { %123 = vrot.lane.b32.xlu1 %v2291_v42, %s2197_s22  ;;  %131 = vrot.lane.b32.xlu0 %v2291_v42, %s2198_s23 }
 0x118   :  { %v2297_v43 = vpop.f32.mrf.mxu0 }
 0x119   :  { %127 = vrot.lane.b32.xlu1 %v2291_v42, %s2199_s24  ;;  %121 = vrot.lane.b32.xlu2 %v2297_v43, %s2197_s22 }
 0x11a   :  { %133 = vrot.lane.b32.xlu0 %v2297_v43, %s2200_s25 }
 0x121   :  { %129 = vrot.lane.b32.xlu1 %v2297_v43, %s2198_s23  ;;  %125 = vrot.lane.b32.xlu2 %v2297_v43, %s2199_s24 }
 0x173   :  { %v2313_v45 = vpop.permute.xlu2 %121 }
 0x17b   :  { %v2321_v47 = vpop.permute.xlu2 %125 }
 0x183   :  { %v2309_v44 = vpop.permute.xlu1 %123  ;;  %v2327_v48 = vpop.permute.xlu0 %131 }
 0x184   :  { %171 = vrot.lane.b32.xlu2 %v2309_v44, %s2200_s25 }
 0x18b   :  { %v2315_v46 = vpop.permute.xlu1 %127 }
 0x18c   :  { %206 = vrot.lane.b32.xlu1 %v2315_v46, %s2200_s25  ;;  %169 = vrot.lane.b32.xlu2 %v2313_v45, %s2200_s25  ;;  %v134_v53 = vpop.permute.xlu0 %133 }
 0x193   :  { %v2329_v49 = vpop.permute.xlu1 %129 }
 0x194   :  { %135 = vrot.lane.b32.xlu2 %v2291_v42, %s2200_s25  ;;  %204 = vrot.lane.b32.xlu1 %v2321_v47, %s2200_s25 }
 0x19c   :  { %239 = vrot.lane.b32.xlu2 %v2329_v49, %s2200_s25  ;;  %241 = vrot.lane.b32.xlu1 %v2327_v48, %s2200_s25 }
 0x1de   :  { %v172_v50 = vpop.permute.xlu2 %171 }
 0x1df   :  { %1931 = vmatpush.xpose.msk.msra.mxu2 %vm137_vm8, %v172_v50 }
 0x1e6   :  { %v170_v51 = vpop.permute.xlu2 %169 }
 0x1e7   :  { %1932 = vmatpush.xpose.msk.msra.mxu2 %vm137_vm8, %v170_v51 }
 0x1ea   :  { %1933 = vmatmul.msk.f32.vlgmr.msra.gmra.mxu2 %vm137_vm8, %v2313_v45 }
 0x1ee   :  { %v136_v52 = vpop.permute.xlu2 %135 }
 0x1ef   :  { %1927 = vmatpush.xpose.msk.msrb.mxu1 %vm137_vm8, %v136_v52 }
 0x1f2   :  { %1934 = vmatmul.msk.f32.gmra.mxu2 %vm137_vm8, %v2309_v44 }
 0x1f3   :  { %1928 = vmatpush.xpose.msk.msrb.mxu1 %vm137_vm8, %v134_v53 }
 0x1f6   :  { %1929 = vmatmul.msk.f32.vlgmr.msrb.gmra.mxu1 %vm137_vm8, %v2297_v43  ;;  %v240_v57 = vpop.permute.xlu2 %239 }
 0x1fe   :  { %v207_v54 = vpop.permute.xlu1 %206  ;;  %1930 = vmatmul.msk.f32.gmra.mxu1 %vm137_vm8, %v2291_v42 }
 0x1ff   :  { %1935 = vmatpush.xpose.msk.msra.mxu3 %vm137_vm8, %v207_v54 }
 0x206   :  { %v205_v55 = vpop.permute.xlu1 %204 }
 0x207   :  { %1936 = vmatpush.xpose.msk.msra.mxu3 %vm137_vm8, %v205_v55 }
 0x20a   :  { %1937 = vmatmul.msk.f32.vlgmr.msra.gmra.mxu3 %vm137_vm8, %v2321_v47 }
 0x20e   :  { %v242_v56 = vpop.permute.xlu1 %241 }
 0x20f   :  { %1939 = vmatpush.xpose.msk.msrb.mxu0 %vm137_vm8, %v242_v56 }
 0x212   :  { %1938 = vmatmul.msk.f32.gmra.mxu3 %vm137_vm8, %v2315_v46 }
 0x213   :  { %1940 = vmatpush.xpose.msk.msrb.mxu0 %vm137_vm8, %v240_v57 }
 0x216   :  { %1941 = vmatmul.msk.f32.vlgmr.msrb.gmra.mxu0 %vm137_vm8, %v2329_v49 }
 0x21e   :  { %1942 = vmatmul.msk.f32.gmra.mxu0 %vm137_vm8, %v2327_v48 }
 0x26d   :  { %v198_v59 = vpop.f32.mrf.mxu2 }
 0x26e   :  { %v276_v60 = vmul.f32 0.35355338, %v198_v59 }
 0x270   :  { %v288_v61 = vsel %vm34_vm9, %v276_v60, -2.3819763e+38 }
 0x271   :  { %v301_v62 = vsel %vm294_vm10, %v288_v61, -inf }
 0x272   :  { %302 = vmax.xlane.f32.xlu0 %v301_v62 }
 0x273   :  { %v163_v63 = vpop.f32.mrf.mxu1 }
 0x274   :  { %v274_v1 = vmul.f32 0.35355338, %v163_v63 }
 0x275   :  { %v201_v3 = vpop.f32.mrf.mxu2 }
 0x276   :  { %v286_v4 = vsel %vm34_vm9, %v274_v1, -2.3819763e+38  ;;  %v277_v7 = vmul.f32 0.35355338, %v201_v3 }
 0x277   :  { %v295_v6 = vsel %vm294_vm10, %v286_v4, -inf }
 0x278   :  { %296 = vmax.xlane.f32.xlu2 %v295_v6  ;;  %v289_v8 = vsel %vm35_vm11, %v277_v7, -2.3819763e+38 }
 0x279   :  { %v304_v9 = vsel %vm294_vm10, %v289_v8, -inf }
 0x27b   :  { %v166_v20 = vpop.f32.mrf.mxu1 }
 0x27c   :  { %v275_v24 = vmul.f32 0.35355338, %v166_v20 }
 0x27e   :  { %v287_v28 = vsel %vm35_vm11, %v275_v24, -2.3819763e+38 }
 0x27f   :  { %v298_v30 = vsel %vm294_vm10, %v287_v28, -inf }
 0x280   :  { %305 = vmax.xlane.f32.xlu2 %v304_v9 }
 0x28d   :  { %v233_v10 = vpop.f32.mrf.mxu3 }
 0x28e   :  { %v278_v11 = vmul.f32 0.35355338, %v233_v10 }
 0x290   :  { %v290_v12 = vsel %vm34_vm9, %v278_v11, -2.3819763e+38 }
 0x291   :  { %v307_v13 = vsel %vm294_vm10, %v290_v12, -inf }
 0x292   :  { %308 = vmax.xlane.f32.xlu1 %v307_v13 }
 0x293   :  { %v268_v14 = vpop.f32.mrf.mxu0 }
 0x294   :  { %v280_v15 = vmul.f32 0.35355338, %v268_v14  ;;  %v2054_v14 = vpack.i.bf16 %v2321_v47, %v2315_v46  ;;  %v2049_v47 = vpack.i.bf16 %v2313_v45, %v2309_v44 }
 0x295   :  { %v236_v17 = vpop.f32.mrf.mxu3 }
 0x296   :  { %v279_v18 = vmul.f32 0.35355338, %v236_v17  ;;  %v292_v19 = vsel %vm34_vm9, %v280_v15, -2.3819763e+38 }
 0x297   :  { %v313_v23 = vsel %vm294_vm10, %v292_v19, -inf }
 0x298   :  { %v291_v21 = vsel %vm35_vm11, %v279_v18, -2.3819763e+38 }
 0x299   :  { %v310_v22 = vsel %vm294_vm10, %v291_v21, -inf }
 0x29a   :  { %311 = vmax.xlane.f32.xlu0 %v310_v22  ;;  %314 = vmax.xlane.f32.xlu1 %v313_v23 }
 0x29b   :  { %v271_v25 = vpop.f32.mrf.mxu0 }
 0x29c   :  { %v281_v26 = vmul.f32 0.35355338, %v271_v25 }
 0x29e   :  { %v293_v27 = vsel %vm35_vm11, %v281_v26, -2.3819763e+38 }
 0x29f   :  { %v316_v29 = vsel %vm294_vm10, %v293_v27, -inf }
 0x2a0   :  { %317 = vmax.xlane.f32.xlu2 %v316_v29 }
 0x2a2   :  { %299 = vmax.xlane.f32.xlu0 %v298_v30 }
 0x2e5   :  { %v303_v31 = vpop.xlane.xlu0 %302 }
 0x2e6   :  { %v321_v32 = vsub.f32 %v288_v61, %v303_v31 }
 0x2e8   :  { %v331_v33 = vmul.f32 1.442695, %v321_v32 }
 0x2ea   :  { %2100 = vpow2.f32 %v331_v33 }
 0x2eb   :  { %v297_v34 = vpop.xlane.xlu2 %296 }
 0x2ec   :  { %v319_v35 = vsub.f32 %v286_v4, %v297_v34 }
 0x2ee   :  { %v327_v36 = vmul.f32 1.442695, %v319_v35 }
 0x2f0   :  { %v2395_v37 = vpop.eup %2100  ;;  %2102 = vpow2.f32 %v327_v36 }
 0x2f1   :  { %v349_v38 = vsel %vm294_vm10, %v2395_v37, 0.0 }
 0x2f2   :  { %350 = vadd.xlane.f32.xlu1 %v349_v38 }
 0x2f3   :  { %v306_v52 = vpop.xlane.xlu2 %305 }
 0x2f4   :  { %v322_v59 = vsub.f32 %v289_v8, %v306_v52 }
 0x2f6   :  { %v2399_v39 = vpop.eup %2102  ;;  %v333_v63 = vmul.f32 1.442695, %v322_v59 }
 0x2f7   :  { %v343_v40 = vsel %vm294_vm10, %v2399_v39, 0.0 }
 0x2f8   :  { %344 = vadd.xlane.f32.xlu0 %v343_v40 }
 0x305   :  { %v309_v41 = vpop.xlane.xlu1 %308 }
 0x306   :  { %v323_v50 = vsub.f32 %v290_v12, %v309_v41 }
 0x308   :  { %v335_v51 = vmul.f32 1.442695, %v323_v50 }
 0x30a   :  { %2104 = vpow2.f32 %v335_v51 }
 0x30d   :  { %v315_v53 = vpop.xlane.xlu1 %314  ;;  %v312_v54 = vpop.xlane.xlu0 %311 }
 0x30e   :  { %v325_v55 = vsub.f32 %v292_v19, %v315_v53  ;;  %v324_v56 = vsub.f32 %v291_v21, %v312_v54  ;;  %v2064_v19 = vpack.i.bf16 %v2329_v49, %v2327_v48  ;;  %v2059_v21 = vpack.i.bf16 %v2297_v43, %v2291_v42 }
 0x310   :  { %v2403_v57 = vpop.eup %2104  ;;  %v339_v60 = vmul.f32 1.442695, %v325_v55  ;;  %v337_v61 = vmul.f32 1.442695, %v324_v56 }
 0x311   :  { %v355_v62 = vsel %vm294_vm10, %v2403_v57, 0.0 }
 0x312   :  { %2106 = vpow2.f32 %v339_v60  ;;  %356 = vadd.xlane.f32.xlu0 %v355_v62 }
 0x313   :  { %2108 = vpow2.f32 %v337_v61  ;;  %v318_v10 = vpop.xlane.xlu2 %317 }
 0x314   :  { %2110 = vpow2.f32 %v333_v63  ;;  %v326_v12 = vsub.f32 %v293_v27, %v318_v10 }
 0x315   :  { %v300_v1 = vpop.xlane.xlu0 %299 }
 0x316   :  { %v320_v4 = vsub.f32 %v287_v28, %v300_v1  ;;  %v341_v15 = vmul.f32 1.442695, %v326_v12 }
 0x318   :  { %v2407_v3 = vpop.eup %2106  ;;  %v329_v9 = vmul.f32 1.442695, %v320_v4 }
 0x319   :  { %v2409_v6 = vpop.eup %2108  ;;  %v361_v7 = vsel %vm294_vm10, %v2407_v3, 0.0 }
 0x31a   :  { %362 = vadd.xlane.f32.xlu2 %v361_v7  ;;  %v358_v8 = vsel %vm294_vm10, %v2409_v6, 0.0  ;;  %v2415_v11 = vpop.eup %2110  ;;  %2112 = vpow2.f32 %v329_v9 }
 0x31b   :  { %359 = vadd.xlane.f32.xlu1 %v358_v8  ;;  %v352_v13 = vsel %vm294_vm10, %v2415_v11, 0.0  ;;  %2114 = vpow2.f32 %v341_v15 }
 0x320   :  { %v2421_v17 = vpop.eup %2112 }
 0x321   :  { %v346_v18 = vsel %vm294_vm10, %v2421_v17, 0.0  ;;  %v2428_v20 = vpop.eup %2114 }
 0x322   :  { %353 = vadd.xlane.f32.xlu2 %v352_v13  ;;  %v364_v46 = vsel %vm294_vm10, %v2428_v20, 0.0 }
 0x326   :  { %2055 = vrot.lane.b32.xlu0 %v2054_v14, %s2201_s1 }
 0x32a   :  { %347 = vadd.xlane.f32.xlu2 %v346_v18 }
 0x32e   :  { %2065 = vrot.lane.b32.xlu0 %v2064_v19, %s2201_s1 }
 0x332   :  { %365 = vadd.xlane.f32.xlu2 %v364_v46 }
 0x334   :  { %2050 = vrot.lane.b32.xlu1 %v2049_v47, %s2201_s1 }
 0x34a   :  { %2060 = vrot.lane.b32.xlu2 %v2059_v21, %s2201_s1 }
 0x365   :  { %v2441_v48 = vpop.xlane.xlu1 %350 }
 0x366   :  { %vm402_vm6 = vweird.f32 %v2441_v48 }
 0x36b   :  { %v2439_v22 = vpop.xlane.xlu0 %344 }
 0x385   :  { %v357_v49 = vpop.xlane.xlu0 %356 }
 0x386   :  { %2116 = vrcp.f32 %v357_v49  ;;  %v438_v29 = vand.u32 2147483648, %v357_v49  ;;  %vm432_vm13 = vweird.f32 %v357_v49  ;;  %v436_v32 = vand.u32 2147483647, %v357_v49 }
 0x387   :  { %2118 = vrcp.f32 %v2441_v48 }
 0x388   :  { %2120 = vrcp.f32 %v2439_v22  ;;  %v439_v50 = vor.u32 1.1754944e-38, %v438_v29  ;;  %vm437_vm15 = vcmp.eq.f32.partialorder %v436_v32, 8.507059e+37 }
 0x38c   :  { %v2117_v23 = vpop.eup %2116 }
 0x38d   :  { %v2445_v44 = vpop.eup %2118  ;;  %v428_v45 = vmul.f32 %v2117_v23, %v357_v49  ;;  %v2447_v24 = vpop.xlane.xlu2 %362  ;;  %vm433_vm12 = vweird.f32 %v2117_v23 }
 0x38e   :  { %2122 = vrcp.f32 %v2447_v24  ;;  %v2450_v42 = vpop.xlane.xlu1 %359  ;;  %v398_v25 = vmul.f32 %v2445_v44, %v2441_v48  ;;  %v2455_v27 = vpop.eup %2120  ;;  %vm2459_vm14 = vmor %vm432_vm13, %vm433_vm12  ;;  %vm462_vm1 = vweird.f32 %v2447_v24  ;;  %v468_v61 = vand.u32 2147483648, %v2447_v24 }
 0x38f   :  { %v429_v43 = vsub.f32 1.0, %v428_v45  ;;  %2124 = vrcp.f32 %v2450_v42  ;;  %v368_v34 = vmul.f32 %v2455_v27, %v2439_v22  ;;  %v453_v1 = vand.u32 2147483648, %v2450_v42 }
 0x390   :  { %v399_v31 = vsub.f32 1.0, %v398_v25  ;;  %v466_v8 = vand.u32 2147483647, %v2447_v24  ;;  %v451_v12 = vand.u32 2147483647, %v2450_v42  ;;  %vm447_vm5 = vweird.f32 %v2450_v42 }
 0x391   :  { %v430_v26 = vmul.f32 %v2117_v23, %v429_v43  ;;  %v369_v55 = vsub.f32 1.0, %v368_v34  ;;  %vm403_vm7 = vweird.f32 %v2445_v44  ;;  %v469_v19 = vor.u32 1.1754944e-38, %v468_v61 }
 0x392   :  { %v400_v52 = vmul.f32 %v2445_v44, %v399_v31  ;;  %v454_v46 = vor.u32 1.1754944e-38, %v453_v1  ;;  %vm467_vm13 = vcmp.eq.f32.partialorder %v466_v8, 8.507059e+37  ;;  %v408_v45 = vand.u32 2147483648, %v2441_v48 }
 0x393   :  { %v431_v28 = vadd.f32 %v2117_v23, %v430_v26  ;;  %v370_v21 = vmul.f32 %v2455_v27, %v369_v55  ;;  %v406_v26 = vand.u32 2147483647, %v2441_v48  ;;  %v378_v48 = vand.u32 2147483648, %v2439_v22 }
 0x394   :  { %v2123_v30 = vpop.eup %2122  ;;  %v401_v18 = vadd.f32 %v2445_v44, %v400_v52  ;;  %v409_v35 = vor.u32 1.1754944e-38, %v408_v45 }
 0x395   :  { %v2125_v33 = vpop.eup %2124  ;;  %v458_v36 = vmul.f32 %v2123_v30, %v2447_v24  ;;  %v2464_v38 = vpop.xlane.xlu2 %353  ;;  %v435_v41 = vsel %vm2459_vm14, %v2117_v23, %v431_v28  ;;  %vm463_vm2 = vweird.f32 %v2123_v30  ;;  %vm452_vm14 = vcmp.eq.f32.partialorder %v451_v12, 8.507059e+37 }
 0x396   :  { %v443_v40 = vmul.f32 %v2125_v33, %v2450_v42  ;;  %2126 = vrcp.f32 %v2464_v38  ;;  %v440_v60 = vsel %vm437_vm15, %v439_v50, %v435_v41  ;;  %vm448_vm3 = vweird.f32 %v2125_v33  ;;  %vm2479_vm4 = vmor %vm462_vm1, %vm463_vm2 }
 0x397   :  { %v459_v51 = vsub.f32 1.0, %v458_v36  ;;  %v441_v9 = vmul.f32 %v2403_v57, %v440_v60  ;;  %vm449_vm12 = vmor %vm447_vm5, %vm448_vm3  ;;  %vm373_vm1 = vweird.f32 %v2455_v27  ;;  %v371_v31 = vadd.f32 %v2455_v27, %v370_v21 }
 0x398   :  { %v444_v53 = vsub.f32 1.0, %v443_v40  ;;  %v2056_v54 = vpop.permute.xlu0 %2055  ;;  %vm2502_vm15 = vmor %vm402_vm6, %vm403_vm7  ;;  %vm407_vm2 = vcmp.eq.f32.partialorder %v406_v26, 8.507059e+37  ;;  %vm372_vm3 = vweird.f32 %v2439_v22  ;;  %vm417_vm7 = vweird.f32 %v2464_v38 }
 0x399   :  { %v460_v56 = vmul.f32 %v2123_v30, %v459_v51  ;;  %v2057_v59 = vunpack.i.l.bf16 %v2056_v54  ;;  %v2058_v4 = vunpack.i.h.bf16 %v2056_v54  ;;  %v405_v29 = vsel %vm2502_vm15, %v2445_v44, %v401_v18 }
 0x39a   :  { %v445_v62 = vmul.f32 %v2125_v33, %v444_v53  ;;  %v376_v44 = vand.u32 2147483647, %v2439_v22  ;;  %v410_v51 = vsel %vm407_vm2, %v409_v35, %v405_v29  ;;  %v379_v53 = vor.u32 1.1754944e-38, %v378_v48 }
 0x39b   :  { %v461_v63 = vadd.f32 %v2123_v30, %v460_v56  ;;  %583 = vmatpush.msrb.mxu3 %v2057_v59  ;;  %v423_v54 = vand.u32 2147483648, %v2464_v38  ;;  %v411_v56 = vmul.f32 %v2395_v37, %v410_v51  ;;  %v421_v59 = vand.u32 2147483647, %v2464_v38 }
 0x39c   :  { %v2474_v7 = vpop.eup %2126  ;;  %v446_v10 = vadd.f32 %v2125_v33, %v445_v62  ;;  %vm377_vm6 = vcmp.eq.f32.partialorder %v376_v44, 8.507059e+37 }
 0x39d   :  { %v413_v14 = vmul.f32 %v2474_v7, %v2464_v38  ;;  %v2486_v15 = vpop.xlane.xlu2 %347  ;;  %584 = vmatpush.msrb.mxu3 %v2058_v4  ;;  %v465_v57 = vsel %vm2479_vm4, %v2123_v30, %v461_v63  ;;  %vm2529_vm4 = vmor %vm372_vm3, %vm373_vm1  ;;  %vm418_vm5 = vweird.f32 %v2474_v7  ;;  %v424_v63 = vor.u32 1.1754944e-38, %v423_v54 }
 0x39e   :  { %2128 = vrcp.f32 %v2486_v15  ;;  %1947 = vmatmul.msk.f32.vlgmr.msrb.gmra.mxu3 %vm294_vm10, %v441_v9  ;;  %v450_v47 = vsel %vm449_vm12, %v2125_v33, %v446_v10  ;;  %v470_v24 = vsel %vm467_vm13, %v469_v19, %v465_v57  ;;  %v375_v22 = vsel %vm2529_vm4, %v2455_v27, %v371_v31  ;;  %vm419_vm12 = vmor %vm417_vm7, %vm418_vm5 }
 0x39f   :  { %v414_v49 = vsub.f32 1.0, %v413_v14  ;;  %v455_v43 = vsel %vm452_vm14, %v454_v46, %v450_v47  ;;  %v471_v34 = vmul.f32 %v2407_v3, %v470_v24  ;;  %v380_v60 = vsel %vm377_vm6, %v379_v53, %v375_v22  ;;  %v629_v24 = vld [vmem:[%s3033_s4 + $0x10] sm:$0xff] }
 0x3a0   :  { %v2066_v23 = vpop.permute.xlu0 %2065  ;;  %v456_v33 = vmul.f32 %v2409_v6, %v455_v43  ;;  %v381_v9 = vmul.f32 %v2399_v39, %v380_v60  ;;  %vm422_vm13 = vcmp.eq.f32.partialorder %v421_v59, 8.507059e+37  ;;  %vm387_vm15 = vweird.f32 %v2486_v15  ;;  %710 = vmatpush.msra.mxu3 %v629_v24 }
 0x3a1   :  { %v2067_v42 = vunpack.i.l.bf16 %v2066_v23  ;;  %v2068_v28 = vunpack.i.h.bf16 %v2066_v23  ;;  %v415_v32 = vmul.f32 %v2474_v7, %v414_v49  ;;  %v393_v12 = vand.u32 2147483648, %v2486_v15 }
 0x3a2   :  { %v391_v39 = vand.u32 2147483647, %v2486_v15 }
 0x3a3   :  { %618 = vmatpush.msra.mxu0 %v2067_v42  ;;  %v416_v52 = vadd.f32 %v2474_v7, %v415_v32  ;;  %v394_v47 = vor.u32 1.1754944e-38, %v393_v12  ;;  %v630_v42 = vld [vmem:[%s3033_s4 + $0x18] sm:$0xff]  ;;  %v838_v12 = vld [vmem:[%s3035_s6 + $0x8] sm:$0xff] }
 0x3a4   :  { %v2511_v30 = vpop.eup %2128  ;;  %vm392_vm6 = vcmp.eq.f32.partialorder %v391_v39, 8.507059e+37 }
 0x3a5   :  { %v383_v36 = vmul.f32 %v2511_v30, %v2486_v15  ;;  %v2520_v40 = vpop.xlane.xlu2 %365  ;;  %619 = vmatpush.msra.mxu0 %v2068_v28  ;;  %v420_v62 = vsel %vm419_vm12, %v2474_v7, %v416_v52  ;;  %vm388_vm14 = vweird.f32 %v2511_v30 }
 0x3a6   :  { %v2051_v41 = vpop.permute.xlu1 %2050  ;;  %2130 = vrcp.f32 %v2520_v40  ;;  %1948 = vmatmul.msk.f32.gmra.mxu3 %vm294_vm10, %v456_v33  ;;  %1949 = vmatmul.msk.f32.vlgmr.msra.gmra.mxu0 %vm294_vm10, %v471_v34  ;;  %v425_v38 = vsel %vm422_vm13, %v424_v63, %v420_v62  ;;  %v483_v7 = vand.u32 2147483648, %v2520_v40  ;;  %v481_v57 = vand.u32 2147483647, %v2520_v40  ;;  %vm389_vm2 = vmor %vm387_vm15, %vm388_vm14 }
 0x3a7   :  { %v384_v6 = vsub.f32 1.0, %v383_v36  ;;  %v2052_v50 = vunpack.i.l.bf16 %v2051_v41  ;;  %v2053_v55 = vunpack.i.h.bf16 %v2051_v41  ;;  %v426_v18 = vmul.f32 %v2415_v11, %v425_v38  ;;  %739 = vmatpush.msrb.mxu0 %v630_v42  ;;  %v839_v38 = vld [vmem:[%s3035_s6 + $0x10] sm:$0xff]  ;;  %v2090_v42 = vld [vmem:[%s3030_s2 + $0x1] ss:$0 sm:$0xff] }
 0x3a8   :  { %vm477_vm3 = vweird.f32 %v2520_v40  ;;  %v484_v21 = vor.u32 1.1754944e-38, %v483_v7  ;;  %vm482_vm5 = vcmp.eq.f32.partialorder %v481_v57, 8.507059e+37  ;;  %v804_v7 = vld [vmem:[%s3034_s5] sm:$0xff] }
 0x3a9   :  { %548 = vmatpush.msrb.mxu2 %v2052_v50  ;;  %v385_v61 = vmul.f32 %v2511_v30, %v384_v6 }
 0x3ab   :  { %549 = vmatpush.msrb.mxu2 %v2053_v55  ;;  %v386_v10 = vadd.f32 %v2511_v30, %v385_v61 }
 0x3ac   :  { %v2131_v27 = vpop.eup %2130  ;;  %1945 = vmatmul.msk.f32.vlgmr.msrb.gmra.mxu2 %vm294_vm10, %v411_v56 }
 0x3ad   :  { %v473_v1 = vmul.f32 %v2131_v27, %v2520_v40  ;;  %v2061_v4 = vpop.permute.xlu2 %2060  ;;  %vm478_vm1 = vweird.f32 %v2131_v27  ;;  %v390_v46 = vsel %vm389_vm2, %v2511_v30, %v386_v10  ;;  %v805_v10 = vld [vmem:[%s3034_s5 + $0x8] sm:$0xff] }
 0x3ae   :  { %v2062_v8 = vunpack.i.l.bf16 %v2061_v4  ;;  %v2063_v13 = vunpack.i.h.bf16 %v2061_v4  ;;  %vm479_vm4 = vmor %vm477_vm3, %vm478_vm1  ;;  %v395_v23 = vsel %vm392_vm6, %v394_v47, %v390_v46  ;;  %vm914_vm6 = vcmask 523264  }
 0x3af   :  { %v474_v37 = vsub.f32 1.0, %v473_v1  ;;  %v396_v45 = vmul.f32 %v2421_v17, %v395_v23  ;;  %v627_v17 = vld [vmem:[%s3033_s4] sm:$0xff] }
 0x3b0   :  { %513 = vmatpush.msra.mxu1 %v2062_v8 }
 0x3b1   :  { %v475_v14 = vmul.f32 %v2131_v27, %v474_v37  ;;  %v840_v37 = vld [vmem:[%s3035_s6 + $0x18] sm:$0xff] }
 0x3b2   :  { %514 = vmatpush.msra.mxu1 %v2063_v13  ;;  %v837_v13 = vld [vmem:[%s3035_s6] sm:$0xff] }
 0x3b3   :  { %1943 = vmatmul.msk.f32.vlgmr.msra.gmra.mxu1 %vm294_vm10, %v381_v9  ;;  %v476_v19 = vadd.f32 %v2131_v27, %v475_v14  ;;  %v807_v9 = vld [vmem:[%s3034_s5 + $0x18] sm:$0xff] }
 0x3b4   :  { %1946 = vmatmul.msk.f32.gmra.mxu2 %vm294_vm10, %v426_v18  ;;  %652 = vmatpush.msrb.mxu1 %v627_v17 }
 0x3b5   :  { %v480_v49 = vsel %vm479_vm4, %v2131_v27, %v476_v19 }
 0x3b6   :  { %v485_v15 = vsel %vm482_vm5, %v484_v21, %v480_v49  ;;  %826 = vmatpush.msra.mxu1 %v807_v9 }
 0x3b7   :  { %v486_v11 = vmul.f32 %v2428_v20, %v485_v15  ;;  %v628_v20 = vld [vmem:[%s3033_s4 + $0x8] sm:$0xff] }
 0x3b8   :  { %681 = vmatpush.msra.mxu2 %v628_v20 }
 0x3b9   :  { %1950 = vmatmul.msk.f32.gmra.mxu0 %vm294_vm10, %v486_v11 }
 0x3ba   :  { %853 = vmatpush.msrb.mxu2 %v840_v37 }
 0x3bb   :  { %1944 = vmatmul.msk.f32.gmra.mxu1 %vm294_vm10, %v396_v45 }
 0x3bc   :  { %854 = vmatpush.msrb.mxu2 %v839_v38 }
 0x3be   :  { %855 = vmatpush.msrb.mxu2 %v838_v12 }
 0x3c0   :  { %856 = vmatpush.msrb.mxu2 %v837_v13 }
 0x421   :  { %v586_v43 = vpop.f32.mrf.mxu3 }
 0x422   :  { %1955 = vmatmul.msk.f32.vlgmr.msra.gmra.mxu3 %vm137_vm8, %v586_v43 }
 0x423   :  { %v621_v25 = vpop.f32.mrf.mxu0 }
 0x424   :  { %1957 = vmatmul.msk.f32.vlgmr.msrb.gmra.mxu0 %vm137_vm8, %v621_v25 }
 0x429   :  { %v589_v26 = vpop.f32.mrf.mxu3 }
 0x42a   :  { %1956 = vmatmul.msk.f32.gmra.mxu3 %vm137_vm8, %v589_v26 }
 0x42f   :  { %v551_v28 = vpop.f32.mrf.mxu2 }
 0x430   :  { %1953 = vmatmul.msk.f32.vlgmr.msra.gmra.mxu2 %vm137_vm8, %v551_v28  ;;  %v516_v29 = vpop.f32.mrf.mxu1 }
 0x431   :  { %1951 = vmatmul.msk.f32.vlgmr.msrb.gmra.mxu1 %vm137_vm8, %v516_v29 }
 0x436   :  { %v624_v30 = vpop.f32.mrf.mxu0 }
 0x437   :  { %v554_v31 = vpop.f32.mrf.mxu2  ;;  %1958 = vmatmul.msk.f32.gmra.mxu0 %vm137_vm8, %v624_v30 }
 0x438   :  { %1954 = vmatmul.msk.f32.gmra.mxu2 %vm137_vm8, %v554_v31  ;;  %v519_v32 = vpop.f32.mrf.mxu1 }
 0x439   :  { %1952 = vmatmul.msk.f32.gmra.mxu1 %vm137_vm8, %v519_v32 }
 0x4a1   :  { %v741_v40 = vpop.f32.mrf.mxu0 }
 0x4a2   :  { %v752_v6 = vsel %vm41_vm0, %v741_v40, 0.0  ;;  %v908_v40 = vld [vmem:[%s3036_s7 + $0x10] sm:$0xff] }
 0x4a5   :  { %v712_v34 = vpop.f32.mrf.mxu3 }
 0x4a6   :  { %v750_v41 = vsel %vm41_vm0, %v712_v34, 0.0  ;;  %v912_v34 = vld [vmem:[%s3036_s7 + $0x30] sm:$0xff] }
 0x4ad   :  { %v715_v22 = vpop.f32.mrf.mxu3 }
 0x4ae   :  { %v654_v33 = vpop.f32.mrf.mxu1  ;;  %v757_v61 = vsel %vm41_vm0, %v715_v22, 0.0 }
 0x4af   :  { %v747_v48 = vsel %vm41_vm0, %v654_v33, 0.0  ;;  %v913_v33 = vld [vmem:[%s3036_s7 + $0x38] sm:$0xff] }
 0x4b0   :  { %929 = vmatpush.msrb.mxu3 %v913_v33 }
 0x4b2   :  { %930 = vmatpush.msrb.mxu3 %v912_v34 }
 0x4b3   :  { %v683_v35 = vpop.f32.mrf.mxu2 }
 0x4b4   :  { %v748_v36 = vsel %vm41_vm0, %v683_v35, 0.0  ;;  %v744_v56 = vpop.f32.mrf.mxu0  ;;  %v911_v35 = vld [vmem:[%s3036_s7 + $0x28] sm:$0xff] }
 0x4b5   :  { %v749_v44 = vadd.f32 %v748_v36, %v747_v48  ;;  %v759_v63 = vsel %vm41_vm0, %v744_v56, 0.0  ;;  %931 = vmatpush.msrb.mxu3 %v911_v35  ;;  %v910_v48 = vld [vmem:[%s3036_s7 + $0x20] sm:$0xff]  ;;  %v909_v36 = vld [vmem:[%s3036_s7 + $0x18] sm:$0xff] }
 0x4b6   :  { %v657_v51 = vpop.f32.mrf.mxu1 }
 0x4b7   :  { %v751_v3 = vadd.f32 %v750_v41, %v749_v44  ;;  %v754_v54 = vsel %vm41_vm0, %v657_v51, 0.0  ;;  %932 = vmatpush.msrb.mxu3 %v910_v48  ;;  %v907_v44 = vld [vmem:[%s3036_s7 + $0x8] sm:$0xff] }
 0x4b9   :  { %v753_v50 = vadd.f32 %v752_v6, %v751_v3  ;;  %933 = vmatpush.msrb.mxu3 %v909_v36  ;;  %v906_v3 = vld [vmem:[%s3036_s7] sm:$0xff] }
 0x4bb   :  { %v686_v52 = vpop.f32.mrf.mxu2  ;;  %v2588_v53 = vadd.f32 %v753_v50, %v2262_v2  ;;  %934 = vmatpush.msrb.mxu3 %v908_v40 }
 0x4bc   :  { %v755_v55 = vsel %vm41_vm0, %v686_v52, 0.0 }
 0x4bd   :  { %v756_v59 = vadd.f32 %v755_v55, %v754_v54  ;;  %v765_v60 = vmul.f32 %v2588_v53, %v2588_v53  ;;  %935 = vmatpush.msrb.mxu3 %v907_v44 }
 0x4bf   :  { %v758_v27 = vadd.f32 %v757_v61, %v756_v59  ;;  %v767_v62 = vsel %vm41_vm0, %v765_v60, 0.0  ;;  %936 = vmatpush.msrb.mxu3 %v906_v3 }
 0x4c0   :  { %768 = vadd.xlane.f32.xlu1 %v767_v62 }
 0x4c1   :  { %v760_v1 = vadd.f32 %v759_v63, %v758_v27 }
 0x4c3   :  { %v2598_v2 = vadd.f32 %v760_v1, %v2255_v0  ;;  %v806_v0 = vld [vmem:[%s3034_s5 + $0x10] sm:$0xff] }
 0x4c4   :  { %827 = vmatpush.msra.mxu1 %v806_v0 }
 0x4c5   :  { %v766_v4 = vmul.f32 %v2598_v2, %v2598_v2 }
 0x4c6   :  { %828 = vmatpush.msra.mxu1 %v805_v10 }
 0x4c7   :  { %v770_v8 = vsel %vm41_vm0, %v766_v4, 0.0 }
 0x4c8   :  { %771 = vadd.xlane.f32.xlu0 %v770_v8  ;;  %829 = vmatpush.msra.mxu1 %v804_v7 }
 0x533   :  { %v769_v14 = vpop.xlane.xlu1 %768 }
 0x534   :  { %v773_v57 = vmul.f32 %v769_v14, %v2280_v16 }
 0x536   :  { %v775_v39 = vadd.f32 1e-06, %v773_v57 }
 0x538   :  { %2132 = vrsqrt.f32 %v775_v39  ;;  %vm783_vm12 = vweird.f32 %v775_v39 }
 0x53b   :  { %v772_v18 = vpop.xlane.xlu0 %771 }
 0x53c   :  { %v774_v19 = vmul.f32 %v772_v18, %v2280_v16 }
 0x53e   :  { %v2133_v46 = vpop.eup %2132  ;;  %v776_v47 = vadd.f32 1e-06, %v774_v19 }
 0x53f   :  { %v778_v21 = vmul.f32 %v2133_v46, %v775_v39  ;;  %vm784_vm7 = vweird.f32 %v2133_v46 }
 0x540   :  { %2134 = vrsqrt.f32 %v776_v47  ;;  %vm785_vm13 = vmor %vm783_vm12, %vm784_vm7  ;;  %vm793_vm15 = vweird.f32 %v776_v47 }
 0x541   :  { %v779_v49 = vmul.f32 %v2133_v46, %v778_v21 }
 0x543   :  { %v780_v15 = vmul.f32 0.5, %v779_v49 }
 0x545   :  { %v781_v23 = vsub.f32 1.5, %v780_v15 }
 0x546   :  { %v2135_v11 = vpop.eup %2134 }
 0x547   :  { %v782_v45 = vmul.f32 %v2133_v46, %v781_v23  ;;  %v788_v24 = vmul.f32 %v2135_v11, %v776_v47  ;;  %vm794_vm14 = vweird.f32 %v2135_v11 }
 0x548   :  { %vm795_vm1 = vmor %vm793_vm15, %vm794_vm14 }
 0x549   :  { %v786_v20 = vsel %vm785_vm13, %v2133_v46, %v782_v45  ;;  %v789_v17 = vmul.f32 %v2135_v11, %v788_v24 }
 0x54a   :  { %v797_v43 = vmul.f32 %v786_v20, %v2588_v53 }
 0x54b   :  { %v790_v25 = vmul.f32 0.5, %v789_v17  ;;  %v1971_v17 = vld [vmem:[%s3031_s3 + $0x30] sm:$0xff] }
 0x54c   :  { %v802_v26 = vmul.f32 %v2090_v42, %v797_v43  ;;  %v1969_v43 = vld [vmem:[%s3031_s3 + $0x20] sm:$0xff] }
 0x54d   :  { %v791_v28 = vsub.f32 1.5, %v790_v25 }
 0x54e   :  { %1960 = vmatmul.msk.f32.vlgmr.msra.gmra.mxu1 %vm41_vm0, %v802_v26  ;;  %1962 = vmatmul.msk.f32.vlgmr.msrb.gmra.mxu2 %vm41_vm0, %v802_v26 }
 0x54f   :  { %v792_v29 = vmul.f32 %v2135_v11, %v791_v28 }
 0x551   :  { %v796_v30 = vsel %vm795_vm1, %v2135_v11, %v792_v29 }
 0x552   :  { %v798_v31 = vmul.f32 %v796_v30, %v2598_v2 }
 0x554   :  { %v803_v32 = vmul.f32 %v2090_v42, %v798_v31 }
 0x556   :  { %1961 = vmatmul.msk.f32.gmra.mxu1 %vm41_vm0, %v803_v32  ;;  %1963 = vmatmul.msk.f32.gmra.mxu2 %vm41_vm0, %v803_v32 }
 0x5cb   :  { %v831_v41 = vpop.f32.mrf.mxu1 }
 0x5cc   :  { %v1964_v6 = vmul.f32 -1.442695, %v831_v41 }
 0x5ce   :  { %2136 = vpow2.f32 %v1964_v6 }
 0x5d1   :  { %v858_v0 = vpop.f32.mrf.mxu2 }
 0x5d3   :  { %v834_v50 = vpop.f32.mrf.mxu1 }
 0x5d4   :  { %v2137_v51 = vpop.eup %2136  ;;  %v1965_v22 = vmul.f32 -1.442695, %v834_v50 }
 0x5d5   :  { %v870_v52 = vadd.f32 1.0, %v2137_v51 }
 0x5d6   :  { %2138 = vpow2.f32 %v1965_v22 }
 0x5d7   :  { %2140 = vrcp.f32 %v870_v52  ;;  %v883_v61 = vand.u32 2147483648, %v870_v52  ;;  %v881_v62 = vand.u32 2147483647, %v870_v52  ;;  %vm877_vm3 = vweird.f32 %v870_v52 }
 0x5d9   :  { %v884_v4 = vor.u32 1.1754944e-38, %v883_v61  ;;  %vm882_vm5 = vcmp.eq.f32.partialorder %v881_v62, 8.507059e+37  ;;  %v861_v47 = vpop.f32.mrf.mxu2 }
 0x5dc   :  { %v2139_v54 = vpop.eup %2138 }
 0x5dd   :  { %v2141_v55 = vpop.eup %2140  ;;  %v871_v56 = vadd.f32 1.0, %v2139_v54 }
 0x5de   :  { %v873_v59 = vmul.f32 %v2141_v55, %v870_v52  ;;  %vm878_vm2 = vweird.f32 %v2141_v55 }
 0x5df   :  { %2142 = vrcp.f32 %v871_v56  ;;  %vm879_vm4 = vmor %vm877_vm3, %vm878_vm2  ;;  %v898_v12 = vand.u32 2147483648, %v871_v56  ;;  %v896_v14 = vand.u32 2147483647, %v871_v56  ;;  %vm892_vm12 = vweird.f32 %v871_v56 }
 0x5e0   :  { %v874_v60 = vsub.f32 1.0, %v873_v59 }
 0x5e1   :  { %v899_v39 = vor.u32 1.1754944e-38, %v898_v12  ;;  %vm897_vm14 = vcmp.eq.f32.partialorder %v896_v14, 8.507059e+37 }
 0x5e2   :  { %v875_v27 = vmul.f32 %v2141_v55, %v874_v60 }
 0x5e4   :  { %v876_v63 = vadd.f32 %v2141_v55, %v875_v27 }
 0x5e5   :  { %v2143_v1 = vpop.eup %2142 }
 0x5e6   :  { %v880_v8 = vsel %vm879_vm4, %v2141_v55, %v876_v63  ;;  %v888_v9 = vmul.f32 %v2143_v1, %v871_v56  ;;  %vm893_vm7 = vweird.f32 %v2143_v1 }
 0x5e7   :  { %v885_v37 = vsel %vm882_vm5, %v884_v4, %v880_v8  ;;  %vm894_vm13 = vmor %vm892_vm12, %vm893_vm7 }
 0x5e8   :  { %v902_v38 = vmul.f32 %v885_v37, %v831_v41  ;;  %v889_v10 = vsub.f32 1.0, %v888_v9  ;;  %v2091_v41 = vld [vmem:[%s3030_s2 + $0x2] ss:$0 sm:$0xff] }
 0x5ea   :  { %v904_v7 = vmul.f32 %v902_v38, %v858_v0  ;;  %v890_v13 = vmul.f32 %v2143_v1, %v889_v10 }
 0x5ec   :  { %v891_v57 = vadd.f32 %v2143_v1, %v890_v13  ;;  %1966 = vmatmul.msk.f32.vlgmr.msrb.gmra.mxu3 %vm914_vm6, %v904_v7 }
 0x5ee   :  { %v895_v18 = vsel %vm894_vm13, %v2143_v1, %v891_v57 }
 0x5ef   :  { %v900_v19 = vsel %vm897_vm14, %v899_v39, %v895_v18 }
 0x5f0   :  { %v903_v46 = vmul.f32 %v900_v19, %v834_v50 }
 0x5f2   :  { %v905_v21 = vmul.f32 %v903_v46, %v861_v47 }
 0x5f4   :  { %1967 = vmatmul.msk.f32.gmra.mxu3 %vm914_vm6, %v905_v21 }
 0x66f   :  { %v938_v49 = vpop.f32.mrf.mxu3 }
 0x670   :  { %v2665_v15 = vadd.f32 %v938_v49, %v2588_v53  ;;  %v1972_v53 = vld [vmem:[%s3031_s3 + $0x38] sm:$0xff] }
 0x671   :  { %1010 = vmatpush.msra.mxu0 %v1972_v53 }
 0x672   :  { %v948_v23 = vmul.f32 %v2665_v15, %v2665_v15 }
 0x673   :  { %1011 = vmatpush.msra.mxu0 %v1971_v17 }
 0x674   :  { %v950_v11 = vsel %vm41_vm0, %v948_v23, 0.0 }
 0x675   :  { %951 = vadd.xlane.f32.xlu2 %v950_v11 }
 0x677   :  { %v941_v45 = vpop.f32.mrf.mxu3 }
 0x678   :  { %v2671_v24 = vadd.f32 %v941_v45, %v2598_v2  ;;  %v1970_v2 = vld [vmem:[%s3031_s3 + $0x28] sm:$0xff] }
 0x679   :  { %1012 = vmatpush.msra.mxu0 %v1970_v2 }
 0x67a   :  { %v949_v42 = vmul.f32 %v2671_v24, %v2671_v24 }
 0x67b   :  { %1013 = vmatpush.msra.mxu0 %v1969_v43 }
 0x67c   :  { %v953_v20 = vsel %vm41_vm0, %v949_v42, 0.0 }
 0x67d   :  { %954 = vadd.xlane.f32.xlu1 %v953_v20 }
 0x6e8   :  { %v952_v25 = vpop.xlane.xlu2 %951 }
 0x6e9   :  { %v956_v26 = vmul.f32 %v952_v25, %v2280_v16 }
 0x6eb   :  { %v958_v28 = vadd.f32 1e-06, %v956_v26 }
 0x6ed   :  { %2144 = vrsqrt.f32 %v958_v28  ;;  %vm966_vm1 = vweird.f32 %v958_v28 }
 0x6f0   :  { %v955_v29 = vpop.xlane.xlu1 %954 }
 0x6f1   :  { %v957_v30 = vmul.f32 %v955_v29, %v2280_v16 }
 0x6f3   :  { %v2145_v31 = vpop.eup %2144  ;;  %v959_v32 = vadd.f32 1e-06, %v957_v30 }
 0x6f4   :  { %v961_v33 = vmul.f32 %v2145_v31, %v958_v28  ;;  %vm967_vm15 = vweird.f32 %v2145_v31 }
 0x6f5   :  { %2146 = vrsqrt.f32 %v959_v32  ;;  %vm968_vm2 = vmor %vm966_vm1, %vm967_vm15  ;;  %vm976_vm4 = vweird.f32 %v959_v32 }
 0x6f6   :  { %v962_v34 = vmul.f32 %v2145_v31, %v961_v33 }
 0x6f8   :  { %v963_v35 = vmul.f32 0.5, %v962_v34 }
 0x6fa   :  { %v964_v48 = vsub.f32 1.5, %v963_v35 }
 0x6fb   :  { %v2147_v36 = vpop.eup %2146 }
 0x6fc   :  { %v965_v40 = vmul.f32 %v2145_v31, %v964_v48  ;;  %v971_v44 = vmul.f32 %v2147_v36, %v959_v32  ;;  %vm977_vm3 = vweird.f32 %v2147_v36 }
 0x6fd   :  { %vm978_vm5 = vmor %vm976_vm4, %vm977_vm3 }
 0x6fe   :  { %v969_v3 = vsel %vm968_vm2, %v2145_v31, %v965_v40  ;;  %v972_v6 = vmul.f32 %v2147_v36, %v971_v44 }
 0x6ff   :  { %v980_v50 = vmul.f32 %v969_v3, %v2665_v15 }
 0x700   :  { %v973_v51 = vmul.f32 0.5, %v972_v6 }
 0x701   :  { %v985_v22 = vmul.f32 %v2091_v41, %v980_v50 }
 0x702   :  { %v974_v52 = vsub.f32 1.5, %v973_v51 }
 0x703   :  { %1973 = vmatmul.msk.f32.vlgmr.msra.gmra.mxu0 %vm41_vm0, %v985_v22 }
 0x704   :  { %v975_v54 = vmul.f32 %v2147_v36, %v974_v52 }
 0x706   :  { %v979_v55 = vsel %vm978_vm5, %v2147_v36, %v975_v54 }
 0x707   :  { %v981_v56 = vmul.f32 %v979_v55, %v2671_v24 }
 0x709   :  { %v986_v59 = vmul.f32 %v2091_v41, %v981_v56 }
 0x70b   :  { %1974 = vmatmul.msk.f32.gmra.mxu0 %vm41_vm0, %v986_v59 }
 0x780   :  { %v2697_v60 = vpop.f32.mrf.mxu0 }
 0x781   :  { %1023 = vrot.lane.b32.xlu2 %v2697_v60, %s2197_s22 }
 0x788   :  { %v2701_v61 = vpop.f32.mrf.mxu0 }
 0x789   :  { %1029 = vrot.lane.b32.xlu1 %v2701_v61, %s2199_s24  ;;  %1025 = vrot.lane.b32.xlu0 %v2701_v61, %s2197_s22 }
 0x791   :  { %1033 = vrot.lane.b32.xlu1 %v2701_v61, %s2198_s23  ;;  %1027 = vrot.lane.b32.xlu0 %v2697_v60, %s2199_s24 }
 0x799   :  { %1031 = vrot.lane.b32.xlu0 %v2697_v60, %s2198_s23 }
 0x7db   :  { %v2713_v27 = vpop.permute.xlu2 %1023 }
 0x7dc   :  { %1070 = vrot.lane.b32.xlu2 %v2713_v27, %s2200_s25 }
 0x7e4   :  { %1035 = vrot.lane.b32.xlu2 %v2697_v60, %s2200_s25 }
 0x7fb   :  { %v2719_v62 = vpop.permute.xlu1 %1029  ;;  %v2721_v63 = vpop.permute.xlu0 %1025 }
 0x7fc   :  { %1107 = vrot.lane.b32.xlu0 %v2719_v62, %s2200_s25  ;;  %1072 = vrot.lane.b32.xlu1 %v2721_v63, %s2200_s25  ;;  %v2069_v44 = vpack.i.bf16 %v2713_v27, %v2721_v63 }
 0x803   :  { %v2727_v1 = vpop.permute.xlu0 %1027  ;;  %v2733_v4 = vpop.permute.xlu1 %1033 }
 0x804   :  { %1037 = vrot.lane.b32.xlu0 %v2701_v61, %s2200_s25  ;;  %1105 = vrot.lane.b32.xlu1 %v2727_v1, %s2200_s25 }
 0x80b   :  { %v2735_v8 = vpop.permute.xlu0 %1031 }
 0x80c   :  { %1142 = vrot.lane.b32.xlu1 %v2733_v4, %s2200_s25  ;;  %1140 = vrot.lane.b32.xlu0 %v2735_v8, %s2200_s25 }
 0x836   :  { %v1071_v0 = vpop.permute.xlu2 %1070 }
 0x83e   :  { %v1036_v12 = vpop.permute.xlu2 %1035 }
 0x86e   :  { %v1073_v9 = vpop.permute.xlu1 %1072  ;;  %v1108_v37 = vpop.permute.xlu0 %1107 }
 0x86f   :  { %1979 = vmatpush.xpose.msk.msra.mxu2 %vm137_vm8, %v1073_v9  ;;  %1983 = vmatpush.xpose.msk.msra.mxu3 %vm137_vm8, %v1108_v37 }
 0x873   :  { %1980 = vmatpush.xpose.msk.msra.mxu2 %vm137_vm8, %v1071_v0 }
 0x876   :  { %1981 = vmatmul.msk.f32.vlgmr.msra.gmra.mxu2 %vm137_vm8, %v2713_v27  ;;  %v1106_v38 = vpop.permute.xlu1 %1105  ;;  %v1038_v10 = vpop.permute.xlu0 %1037 }
 0x877   :  { %1975 = vmatpush.xpose.msk.msrb.mxu1 %vm137_vm8, %v1038_v10  ;;  %1984 = vmatpush.xpose.msk.msra.mxu3 %vm137_vm8, %v1106_v38 }
 0x87a   :  { %1985 = vmatmul.msk.f32.vlgmr.msra.gmra.mxu3 %vm137_vm8, %v2727_v1 }
 0x87b   :  { %1976 = vmatpush.xpose.msk.msrb.mxu1 %vm137_vm8, %v1036_v12 }
 0x87e   :  { %1982 = vmatmul.msk.f32.gmra.mxu2 %vm137_vm8, %v2721_v63  ;;  %v1143_v7 = vpop.permute.xlu1 %1142  ;;  %1977 = vmatmul.msk.f32.vlgmr.msrb.gmra.mxu1 %vm137_vm8, %v2697_v60  ;;  %v1141_v13 = vpop.permute.xlu0 %1140 }
 0x87f   :  { %1987 = vmatpush.xpose.msk.msrb.mxu0 %vm137_vm8, %v1143_v7 }
 0x882   :  { %1986 = vmatmul.msk.f32.gmra.mxu3 %vm137_vm8, %v2719_v62 }
 0x883   :  { %1988 = vmatpush.xpose.msk.msrb.mxu0 %vm137_vm8, %v1141_v13 }
 0x886   :  { %1978 = vmatmul.msk.f32.gmra.mxu1 %vm137_vm8, %v2701_v61  ;;  %1989 = vmatmul.msk.f32.vlgmr.msrb.gmra.mxu0 %vm137_vm8, %v2735_v8 }
 0x88e   :  { %1990 = vmatmul.msk.f32.gmra.mxu0 %vm137_vm8, %v2733_v4 }
 0x8f9   :  { %v1099_v14 = vpop.f32.mrf.mxu2 }
 0x8fa   :  { %v1177_v57 = vmul.f32 0.35355338, %v1099_v14 }
 0x8fb   :  { %v1064_v18 = vpop.f32.mrf.mxu1 }
 0x8fc   :  { %v1185_v39 = vsel %vm34_vm9, %v1177_v57, -2.3819763e+38  ;;  %v1175_v23 = vmul.f32 0.35355338, %v1064_v18 }
 0x8fd   :  { %v1134_v19 = vpop.f32.mrf.mxu3  ;;  %v1197_v46 = vsel %vm294_vm10, %v1185_v39, -inf }
 0x8fe   :  { %v1179_v47 = vmul.f32 0.35355338, %v1134_v19  ;;  %1198 = vmax.xlane.f32.xlu2 %v1197_v46  ;;  %v1183_v2 = vsel %vm34_vm9, %v1175_v23, -2.3819763e+38 }
 0x8ff   :  { %v1191_v30 = vsel %vm294_vm10, %v1183_v2, -inf }
 0x900   :  { %v1187_v21 = vsel %vm34_vm9, %v1179_v47, -2.3819763e+38 }
 0x901   :  { %v1203_v49 = vsel %vm294_vm10, %v1187_v21, -inf  ;;  %v1102_v42 = vpop.f32.mrf.mxu2 }
 0x902   :  { %1204 = vmax.xlane.f32.xlu1 %v1203_v49  ;;  %v1178_v26 = vmul.f32 0.35355338, %v1102_v42 }
 0x903   :  { %v1169_v11 = vpop.f32.mrf.mxu0  ;;  %v1067_v43 = vpop.f32.mrf.mxu1 }
 0x904   :  { %v1181_v45 = vmul.f32 0.35355338, %v1169_v11  ;;  %v1176_v31 = vmul.f32 0.35355338, %v1067_v43  ;;  %v1186_v58 = vsel %vm35_vm11, %v1178_v26, -2.3819763e+38  ;;  %v2079_v26 = vpack.i.bf16 %v2697_v60, %v2701_v61 }
 0x905   :  { %v1137_v20 = vpop.f32.mrf.mxu3  ;;  %v1200_v48 = vsel %vm294_vm10, %v1186_v58, -inf }
 0x906   :  { %v1180_v53 = vmul.f32 0.35355338, %v1137_v20  ;;  %v1189_v17 = vsel %vm34_vm9, %v1181_v45, -2.3819763e+38  ;;  %v1184_v34 = vsel %vm35_vm11, %v1176_v31, -2.3819763e+38  ;;  %v2084_v31 = vpack.i.bf16 %v2735_v8, %v2733_v4 }
 0x907   :  { %v1209_v25 = vsel %vm294_vm10, %v1189_v17, -inf  ;;  %v1194_v36 = vsel %vm294_vm10, %v1184_v34, -inf }
 0x908   :  { %1210 = vmax.xlane.f32.xlu0 %v1209_v25  ;;  %v1188_v28 = vsel %vm35_vm11, %v1180_v53, -2.3819763e+38 }
 0x909   :  { %v1206_v29 = vsel %vm294_vm10, %v1188_v28, -inf }
 0x90a   :  { %1207 = vmax.xlane.f32.xlu2 %v1206_v29  ;;  %1192 = vmax.xlane.f32.xlu1 %v1191_v30  ;;  %v2074_v30 = vpack.i.bf16 %v2727_v1, %v2719_v62 }
 0x90b   :  { %v1172_v32 = vpop.f32.mrf.mxu0 }
 0x90c   :  { %v1182_v33 = vmul.f32 0.35355338, %v1172_v32 }
 0x90e   :  { %v1190_v35 = vsel %vm35_vm11, %v1182_v33, -2.3819763e+38 }
 0x90f   :  { %v1212_v40 = vsel %vm294_vm10, %v1190_v35, -inf }
 0x910   :  { %1201 = vmax.xlane.f32.xlu0 %v1200_v48 }
 0x912   :  { %1195 = vmax.xlane.f32.xlu2 %v1194_v36  ;;  %1213 = vmax.xlane.f32.xlu1 %v1212_v40 }
 0x924   :  { %2070 = vrot.lane.b32.xlu0 %v2069_v44, %s2201_s1 }
 0x971   :  { %v1199_v41 = vpop.xlane.xlu2 %1198 }
 0x972   :  { %v1217_v3 = vsub.f32 %v1185_v39, %v1199_v41 }
 0x974   :  { %v1227_v6 = vmul.f32 1.442695, %v1217_v3 }
 0x975   :  { %v1205_v50 = vpop.xlane.xlu1 %1204 }
 0x976   :  { %2148 = vpow2.f32 %v1227_v6  ;;  %v1219_v37 = vsub.f32 %v1187_v21, %v1205_v50 }
 0x978   :  { %v1231_v0 = vmul.f32 1.442695, %v1219_v37 }
 0x97b   :  { %v1211_v5 = vpop.xlane.xlu0 %1210 }
 0x97c   :  { %v2792_v51 = vpop.eup %2148  ;;  %v1221_v22 = vsub.f32 %v1189_v17, %v1211_v5 }
 0x97d   :  { %v1208_v52 = vpop.xlane.xlu2 %1207  ;;  %v1193_v54 = vpop.xlane.xlu1 %1192  ;;  %v1245_v55 = vsel %vm294_vm10, %v2792_v51, 0.0 }
 0x97e   :  { %v1235_v56 = vmul.f32 1.442695, %v1221_v22  ;;  %v1220_v59 = vsub.f32 %v1188_v28, %v1208_v52  ;;  %v1215_v9 = vsub.f32 %v1183_v2, %v1193_v54  ;;  %1246 = vadd.xlane.f32.xlu0 %v1245_v55 }
 0x980   :  { %2150 = vpow2.f32 %v1235_v56  ;;  %v1233_v27 = vmul.f32 1.442695, %v1220_v59  ;;  %v1223_v63 = vmul.f32 1.442695, %v1215_v9 }
 0x982   :  { %2152 = vpow2.f32 %v1233_v27 }
 0x983   :  { %2154 = vpow2.f32 %v1223_v63  ;;  %v1202_v21 = vpop.xlane.xlu0 %1201 }
 0x984   :  { %2156 = vpow2.f32 %v1231_v0  ;;  %v1218_v11 = vsub.f32 %v1186_v58, %v1202_v21 }
 0x985   :  { %v1196_v38 = vpop.xlane.xlu2 %1195  ;;  %v1214_v10 = vpop.xlane.xlu1 %1213 }
 0x986   :  { %v2796_v12 = vpop.eup %2150  ;;  %v1216_v7 = vsub.f32 %v1184_v34, %v1196_v38  ;;  %v1222_v39 = vsub.f32 %v1190_v35, %v1214_v10  ;;  %v1229_v20 = vmul.f32 1.442695, %v1218_v11 }
 0x987   :  { %v1257_v13 = vsel %vm294_vm10, %v2796_v12, 0.0 }
 0x988   :  { %v2800_v14 = vpop.eup %2152  ;;  %v1225_v57 = vmul.f32 1.442695, %v1216_v7  ;;  %1258 = vadd.xlane.f32.xlu1 %v1257_v13  ;;  %v1237_v47 = vmul.f32 1.442695, %v1222_v39 }
 0x989   :  { %v2802_v18 = vpop.eup %2154  ;;  %v1254_v19 = vsel %vm294_vm10, %v2800_v14, 0.0 }
 0x98a   :  { %2158 = vpow2.f32 %v1225_v57  ;;  %v1239_v46 = vsel %vm294_vm10, %v2802_v18, 0.0  ;;  %1255 = vadd.xlane.f32.xlu0 %v1254_v19  ;;  %v2808_v49 = vpop.eup %2156 }
 0x98b   :  { %1240 = vadd.xlane.f32.xlu2 %v1239_v46  ;;  %2160 = vpow2.f32 %v1237_v47  ;;  %v1251_v42 = vsel %vm294_vm10, %v2808_v49, 0.0 }
 0x98c   :  { %2162 = vpow2.f32 %v1229_v20 }
 0x990   :  { %v2810_v23 = vpop.eup %2158 }
 0x991   :  { %v1242_v45 = vsel %vm294_vm10, %v2810_v23, 0.0  ;;  %v2816_v53 = vpop.eup %2160 }
 0x992   :  { %1243 = vadd.xlane.f32.xlu1 %v1242_v45  ;;  %v1260_v25 = vsel %vm294_vm10, %v2816_v53, 0.0  ;;  %v2822_v28 = vpop.eup %2162 }
 0x993   :  { %1252 = vadd.xlane.f32.xlu2 %v1251_v42  ;;  %v1248_v29 = vsel %vm294_vm10, %v2822_v28, 0.0 }
 0x996   :  { %v2071_v17 = vpop.permute.xlu0 %2070 }
 0x997   :  { %v2072_v2 = vunpack.i.l.bf16 %v2071_v17  ;;  %v2073_v43 = vunpack.i.h.bf16 %v2071_v17 }
 0x999   :  { %1444 = vmatpush.msrb.mxu2 %v2072_v2 }
 0x99a   :  { %1261 = vadd.xlane.f32.xlu1 %v1260_v25 }
 0x99b   :  { %1445 = vmatpush.msrb.mxu2 %v2073_v43 }
 0x99e   :  { %2080 = vrot.lane.b32.xlu0 %v2079_v26, %s2201_s1 }
 0x9a2   :  { %1249 = vadd.xlane.f32.xlu1 %v1248_v29 }
 0x9ab   :  { %2075 = vrot.lane.b32.xlu2 %v2074_v30, %s2201_s1 }
 0x9bb   :  { %2085 = vrot.lane.b32.xlu1 %v2084_v31, %s2201_s1 }
 0x9f1   :  { %v1247_v32 = vpop.xlane.xlu0 %1246 }
 0x9f2   :  { %2164 = vrcp.f32 %v1247_v32  ;;  %v1304_v58 = vand.u32 2147483648, %v1247_v32  ;;  %v1302_v35 = vand.u32 2147483647, %v1247_v32  ;;  %vm1298_vm11 = vweird.f32 %v1247_v32 }
 0x9f4   :  { %v1305_v4 = vor.u32 1.1754944e-38, %v1304_v58  ;;  %vm1303_vm12 = vcmp.eq.f32.partialorder %v1302_v35, 8.507059e+37 }
 0x9f8   :  { %v2165_v60 = vpop.eup %2164 }
 0x9f9   :  { %v1294_v61 = vmul.f32 %v2165_v60, %v1247_v32  ;;  %vm1299_vm9 = vweird.f32 %v2165_v60 }
 0x9fa   :  { %vm1300_vm7 = vmor %vm1298_vm11, %vm1299_vm9 }
 0x9fb   :  { %v1295_v33 = vsub.f32 1.0, %v1294_v61  ;;  %v2833_v48 = vpop.xlane.xlu1 %1258 }
 0x9fd   :  { %v1296_v34 = vmul.f32 %v2165_v60, %v1295_v33  ;;  %v2835_v62 = vpop.xlane.xlu0 %1255 }
 0x9fe   :  { %v1241_v36 = vpop.xlane.xlu2 %1240 }
 0x9ff   :  { %v1297_v1 = vadd.f32 %v2165_v60, %v1296_v34  ;;  %2166 = vrcp.f32 %v1241_v36  ;;  %v1272_v55 = vand.u32 2147483647, %v1241_v36  ;;  %vm1268_vm14 = vweird.f32 %v1241_v36 }
 0xa00   :  { %2168 = vrcp.f32 %v2835_v62  ;;  %v1349_v34 = vand.u32 2147483648, %v2835_v62 }
 0xa01   :  { %v1301_v8 = vsel %vm1300_vm7, %v2165_v60, %v1297_v1  ;;  %vm1273_vm1 = vcmp.eq.f32.partialorder %v1272_v55, 8.507059e+37 }
 0xa02   :  { %v1306_v40 = vsel %vm1303_vm12, %v1305_v4, %v1301_v8  ;;  %v1347_v8 = vand.u32 2147483647, %v2835_v62 }
 0xa03   :  { %v1307_v44 = vmul.f32 %v2792_v51, %v1306_v40  ;;  %v1274_v51 = vand.u32 2147483648, %v1241_v36 }
 0xa05   :  { %v2167_v41 = vpop.eup %2166  ;;  %1993 = vmatmul.msk.f32.vlgmr.msrb.gmra.mxu2 %vm294_vm10, %v1307_v44  ;;  %v2840_v3 = vpop.xlane.xlu1 %1243  ;;  %v1275_v13 = vor.u32 1.1754944e-38, %v1274_v51 }
 0xa06   :  { %v1264_v6 = vmul.f32 %v2167_v41, %v1241_v36  ;;  %v1253_v50 = vpop.xlane.xlu2 %1252  ;;  %2170 = vrcp.f32 %v2840_v3  ;;  %v2843_v5 = vpop.eup %2168  ;;  %vm1269_vm13 = vweird.f32 %v2167_v41  ;;  %vm1283_vm4 = vweird.f32 %v2840_v3 }
 0xa07   :  { %2172 = vrcp.f32 %v1253_v50  ;;  %v1339_v54 = vmul.f32 %v2843_v5, %v2835_v62  ;;  %vm2847_vm15 = vmor %vm1268_vm14, %vm1269_vm13  ;;  %v1332_v46 = vand.u32 2147483647, %v1253_v50  ;;  %v1334_v47 = vand.u32 2147483648, %v1253_v50 }
 0xa08   :  { %v1265_v22 = vsub.f32 1.0, %v1264_v6  ;;  %2174 = vrcp.f32 %v2833_v48  ;;  %v1289_v43 = vand.u32 2147483648, %v2840_v3  ;;  %vm1328_vm5 = vweird.f32 %v1253_v50 }
 0xa09   :  { %v1340_v38 = vsub.f32 1.0, %v1339_v54  ;;  %v1287_v32 = vand.u32 2147483647, %v2840_v3  ;;  %vm1333_vm7 = vcmp.eq.f32.partialorder %v1332_v46, 8.507059e+37  ;;  %v1335_v60 = vor.u32 1.1754944e-38, %v1334_v47 }
 0xa0a   :  { %v1266_v52 = vmul.f32 %v2167_v41, %v1265_v22  ;;  %vm1344_vm12 = vweird.f32 %v2843_v5  ;;  %v1290_v36 = vor.u32 1.1754944e-38, %v1289_v43  ;;  %vm1343_vm13 = vweird.f32 %v2835_v62 }
 0xa0b   :  { %v1341_v17 = vmul.f32 %v2843_v5, %v1340_v38  ;;  %vm1288_vm14 = vcmp.eq.f32.partialorder %v1287_v32, 8.507059e+37 }
 0xa0c   :  { %v2171_v56 = vpop.eup %2170  ;;  %v1267_v59 = vadd.f32 %v2167_v41, %v1266_v52 }
 0xa0d   :  { %v2173_v9 = vpop.eup %2172  ;;  %v1279_v63 = vmul.f32 %v2171_v56, %v2840_v3  ;;  %v2852_v37 = vpop.xlane.xlu1 %1261  ;;  %vm1284_vm2 = vweird.f32 %v2171_v56  ;;  %v1342_v58 = vadd.f32 %v2843_v5, %v1341_v17  ;;  %v1350_v3 = vor.u32 1.1754944e-38, %v1349_v34 }
 0xa0e   :  { %v1271_v0 = vsel %vm2847_vm15, %v2167_v41, %v1267_v59  ;;  %v1324_v10 = vmul.f32 %v2173_v9, %v1253_v50  ;;  %v2076_v7 = vpop.permute.xlu2 %2075  ;;  %vm1329_vm3 = vweird.f32 %v2173_v9  ;;  %vm2862_vm9 = vmor %vm1283_vm4, %vm1284_vm2  ;;  %v2175_v1 = vpop.eup %2174 }
 0xa0f   :  { %v1280_v57 = vsub.f32 1.0, %v1279_v63  ;;  %v2077_v39 = vunpack.i.l.bf16 %v2076_v7  ;;  %v1276_v11 = vsel %vm1273_vm1, %v1275_v13, %v1271_v0  ;;  %v2078_v42 = vunpack.i.h.bf16 %v2076_v7  ;;  %vm1330_vm11 = vmor %vm1328_vm5, %vm1329_vm3 }
 0xa10   :  { %v1325_v19 = vsub.f32 1.0, %v1324_v10  ;;  %v2081_v21 = vpop.permute.xlu0 %2080  ;;  %v1277_v30 = vmul.f32 %v2802_v18, %v1276_v11  ;;  %vm1345_vm15 = vmor %vm1343_vm13, %vm1344_vm12  ;;  %v1354_v41 = vmul.f32 %v2175_v1, %v2833_v48  ;;  %vm1348_vm1 = vcmp.eq.f32.partialorder %v1347_v8, 8.507059e+37 }
 0xa11   :  { %v1281_v45 = vmul.f32 %v2171_v56, %v1280_v57  ;;  %1479 = vmatpush.msrb.mxu3 %v2077_v39  ;;  %v2082_v20 = vunpack.i.l.bf16 %v2081_v21  ;;  %v2083_v25 = vunpack.i.h.bf16 %v2081_v21  ;;  %v1346_v44 = vsel %vm1345_vm15, %v2843_v5, %v1342_v58 }
 0xa12   :  { %v1326_v2 = vmul.f32 %v2173_v9, %v1325_v19  ;;  %v1351_v22 = vsel %vm1348_vm1, %v1350_v3, %v1346_v44  ;;  %v1355_v62 = vsub.f32 1.0, %v1354_v41  ;;  %v1364_v7 = vand.u32 2147483648, %v2833_v48 }
 0xa13   :  { %1480 = vmatpush.msrb.mxu3 %v2078_v42  ;;  %1409 = vmatpush.msra.mxu1 %v2082_v20  ;;  %v1282_v26 = vadd.f32 %v2171_v56, %v1281_v45  ;;  %v1352_v51 = vmul.f32 %v2800_v14, %v1351_v22  ;;  %v1362_v13 = vand.u32 2147483647, %v2833_v48  ;;  %v1377_v42 = vand.u32 2147483647, %v2852_v37 }
 0xa14   :  { %v1327_v29 = vadd.f32 %v2173_v9, %v1326_v2  ;;  %v1356_v59 = vmul.f32 %v2175_v1, %v1355_v62  ;;  %v1365_v19 = vor.u32 1.1754944e-38, %v1364_v7  ;;  %v2012_v7 = vld [vmem:[%s3034_s5 + $0x20] sm:$0xff] }
 0xa15   :  { %1410 = vmatpush.msra.mxu1 %v2083_v25  ;;  %v1250_v61 = vpop.xlane.xlu1 %1249  ;;  %v1286_v18 = vsel %vm2862_vm9, %v2171_v56, %v1282_v26  ;;  %vm1359_vm9 = vweird.f32 %v2175_v1  ;;  %vm1363_vm12 = vcmp.eq.f32.partialorder %v1362_v13, 8.507059e+37  ;;  %vm1378_vm1 = vcmp.eq.f32.partialorder %v1377_v42, 8.507059e+37  ;;  %v2000_v25 = vld [vmem:[%s3033_s4 + $0x28] sm:$0xff]  ;;  %v2018_v13 = vld [vmem:[%s3035_s6 + $0x20] sm:$0xff] }
 0xa16   :  { %v1331_v33 = vsel %vm1330_vm11, %v2173_v9, %v1327_v29  ;;  %2176 = vrcp.f32 %v1250_v61  ;;  %1991 = vmatmul.msk.f32.vlgmr.msra.gmra.mxu1 %vm294_vm10, %v1277_v30  ;;  %v1291_v40 = vsel %vm1288_vm14, %v1290_v36, %v1286_v18  ;;  %v1319_v55 = vand.u32 2147483648, %v1250_v61  ;;  %1578 = vmatpush.msra.mxu2 %v2000_v25 }
 0xa17   :  { %v1336_v35 = vsel %vm1333_vm7, %v1335_v60, %v1331_v33  ;;  %2178 = vrcp.f32 %v2852_v37  ;;  %v1292_v50 = vmul.f32 %v2810_v23, %v1291_v40  ;;  %v1317_v5 = vand.u32 2147483647, %v1250_v61 }
 0xa18   :  { %v1337_v4 = vmul.f32 %v2808_v49, %v1336_v35  ;;  %vm1313_vm3 = vweird.f32 %v1250_v61  ;;  %v1320_v27 = vor.u32 1.1754944e-38, %v1319_v55  ;;  %v1357_v38 = vadd.f32 %v2175_v1, %v1356_v59 }
 0xa19   :  { %vm1318_vm5 = vcmp.eq.f32.partialorder %v1317_v5, 8.507059e+37  ;;  %vm1358_vm11 = vweird.f32 %v2833_v48  ;;  %vm1373_vm14 = vweird.f32 %v2852_v37 }
 0xa1a   :  { %1995 = vmatmul.msk.f32.vlgmr.msrb.gmra.mxu3 %vm294_vm10, %v1337_v4  ;;  %vm1360_vm7 = vmor %vm1358_vm11, %vm1359_vm9 }
 0xa1b   :  { %v1361_v57 = vsel %vm1360_vm7, %v2175_v1, %v1357_v38  ;;  %v2020_v38 = vld [vmem:[%s3035_s6 + $0x30] sm:$0xff] }
 0xa1c   :  { %v2177_v6 = vpop.eup %2176  ;;  %v1366_v47 = vsel %vm1363_vm12, %v1365_v19, %v1361_v57 }
 0xa1d   :  { %v1309_v49 = vmul.f32 %v2177_v6, %v1250_v61  ;;  %v2179_v54 = vpop.eup %2178  ;;  %vm1314_vm2 = vweird.f32 %v2177_v6  ;;  %v1367_v48 = vmul.f32 %v2796_v12, %v1366_v47  ;;  %v1999_v12 = vld [vmem:[%s3033_s4 + $0x20] sm:$0xff] }
 0xa1e   :  { %1992 = vmatmul.msk.f32.gmra.mxu1 %vm294_vm10, %v1292_v50  ;;  %v1369_v9 = vmul.f32 %v2179_v54, %v2852_v37  ;;  %vm1315_vm4 = vmor %vm1313_vm3, %vm1314_vm2  ;;  %vm1374_vm13 = vweird.f32 %v2179_v54 }
 0xa1f   :  { %v1310_v52 = vsub.f32 1.0, %v1309_v49  ;;  %vm1375_vm15 = vmor %vm1373_vm14, %vm1374_vm13  ;;  %1549 = vmatpush.msrb.mxu1 %v1999_v12 }
 0xa20   :  { %v1370_v10 = vsub.f32 1.0, %v1369_v9 }
 0xa21   :  { %v1311_v56 = vmul.f32 %v2177_v6, %v1310_v52 }
 0xa22   :  { %1996 = vmatmul.msk.f32.gmra.mxu3 %vm294_vm10, %v1352_v51  ;;  %v1371_v39 = vmul.f32 %v2179_v54, %v1370_v10  ;;  %v2013_v10 = vld [vmem:[%s3034_s5 + $0x28] sm:$0xff] }
 0xa23   :  { %v1312_v23 = vadd.f32 %v2177_v6, %v1311_v56 }
 0xa24   :  { %v1372_v11 = vadd.f32 %v2179_v54, %v1371_v39 }
 0xa25   :  { %v1316_v63 = vsel %vm1315_vm4, %v2177_v6, %v1312_v23 }
 0xa26   :  { %v1321_v0 = vsel %vm1318_vm5, %v1320_v27, %v1316_v63  ;;  %v1376_v20 = vsel %vm1375_vm15, %v2179_v54, %v1372_v11  ;;  %v2015_v63 = vld [vmem:[%s3034_s5 + $0x38] sm:$0xff] }
 0xa27   :  { %v1322_v14 = vmul.f32 %v2822_v28, %v1321_v0  ;;  %v1379_v28 = vand.u32 2147483648, %v2852_v37  ;;  %v2001_v37 = vld [vmem:[%s3033_s4 + $0x30] sm:$0xff]  ;;  %v2021_v0 = vld [vmem:[%s3035_s6 + $0x38] sm:$0xff]  ;;  %1724 = vmatpush.msra.mxu1 %v2015_v63 }
 0xa28   :  { %1607 = vmatpush.msra.mxu3 %v2001_v37  ;;  %1752 = vmatpush.msrb.mxu2 %v2021_v0 }
 0xa29   :  { %1994 = vmatmul.msk.f32.gmra.mxu2 %vm294_vm10, %v1322_v14  ;;  %v1380_v17 = vor.u32 1.1754944e-38, %v1379_v28  ;;  %v2019_v14 = vld [vmem:[%s3035_s6 + $0x28] sm:$0xff] }
 0xa2a   :  { %1753 = vmatpush.msrb.mxu2 %v2020_v38 }
 0xa2b   :  { %v1381_v2 = vsel %vm1378_vm1, %v1380_v17, %v1376_v20 }
 0xa2c   :  { %v1382_v43 = vmul.f32 %v2816_v53, %v1381_v2  ;;  %v2002_v53 = vld [vmem:[%s3033_s4 + $0x38] sm:$0xff]  ;;  %1754 = vmatpush.msrb.mxu2 %v2019_v14 }
 0xa2d   :  { %v2086_v46 = vpop.permute.xlu1 %2085 }
 0xa2e   :  { %v2087_v21 = vunpack.i.l.bf16 %v2086_v46  ;;  %v2088_v45 = vunpack.i.h.bf16 %v2086_v46  ;;  %1755 = vmatpush.msrb.mxu2 %v2018_v13 }
 0xa30   :  { %1514 = vmatpush.msra.mxu0 %v2087_v21 }
 0xa32   :  { %1515 = vmatpush.msra.mxu0 %v2088_v45 }
 0xa33   :  { %1997 = vmatmul.msk.f32.vlgmr.msra.gmra.mxu0 %vm294_vm10, %v1367_v48 }
 0xa34   :  { %1636 = vmatpush.msrb.mxu0 %v2002_v53 }
 0xa3b   :  { %1998 = vmatmul.msk.f32.gmra.mxu0 %vm294_vm10, %v1382_v43  ;;  %v2092_v43 = vld [vmem:[%s3030_s2 + $0x3] ss:$0 sm:$0xff] }
 0xa88   :  { %v1447_v26 = vpop.f32.mrf.mxu2 }
 0xa89   :  { %2005 = vmatmul.msk.f32.vlgmr.msra.gmra.mxu2 %vm137_vm8, %v1447_v26 }
 0xa93   :  { %v1412_v29 = vpop.f32.mrf.mxu1 }
 0xa94   :  { %2003 = vmatmul.msk.f32.vlgmr.msrb.gmra.mxu1 %vm137_vm8, %v1412_v29 }
 0xa9b   :  { %v1415_v30 = vpop.f32.mrf.mxu1 }
 0xa9c   :  { %2004 = vmatmul.msk.f32.gmra.mxu1 %vm137_vm8, %v1415_v30 }
 0xa9d   :  { %v1482_v31 = vpop.f32.mrf.mxu3 }
 0xa9e   :  { %2007 = vmatmul.msk.f32.vlgmr.msra.gmra.mxu3 %vm137_vm8, %v1482_v31 }
 0xaa5   :  { %v1485_v32 = vpop.f32.mrf.mxu3 }
 0xaa6   :  { %2008 = vmatmul.msk.f32.gmra.mxu3 %vm137_vm8, %v1485_v32 }
 0xaac   :  { %v1450_v60 = vpop.f32.mrf.mxu2 }
 0xaad   :  { %2006 = vmatmul.msk.f32.gmra.mxu2 %vm137_vm8, %v1450_v60 }
 0xab0   :  { %v1517_v61 = vpop.f32.mrf.mxu0 }
 0xab1   :  { %2009 = vmatmul.msk.f32.vlgmr.msrb.gmra.mxu0 %vm137_vm8, %v1517_v61  ;;  %v2033_v61 = vld [vmem:[%s3036_s7 + $0x78] sm:$0xff] }
 0xab2   :  { %1828 = vmatpush.msrb.mxu3 %v2033_v61 }
 0xab8   :  { %v1520_v33 = vpop.f32.mrf.mxu0 }
 0xab9   :  { %2010 = vmatmul.msk.f32.gmra.mxu0 %vm137_vm8, %v1520_v33  ;;  %v2032_v33 = vld [vmem:[%s3036_s7 + $0x70] sm:$0xff] }
 0xaba   :  { %1829 = vmatpush.msrb.mxu3 %v2032_v33 }
 0xb0c   :  { %v1580_v58 = vpop.f32.mrf.mxu2 }
 0xb0d   :  { %v1645_v36 = vsel %vm41_vm0, %v1580_v58, 0.0  ;;  %v2030_v58 = vld [vmem:[%s3036_s7 + $0x60] sm:$0xff] }
 0xb11   :  { %v1551_v18 = vpop.f32.mrf.mxu1 }
 0xb12   :  { %v1644_v35 = vsel %vm41_vm0, %v1551_v18, 0.0  ;;  %v2031_v18 = vld [vmem:[%s3036_s7 + $0x68] sm:$0xff] }
 0xb13   :  { %v1646_v4 = vadd.f32 %v1645_v36, %v1644_v35  ;;  %1830 = vmatpush.msrb.mxu3 %v2031_v18  ;;  %v2028_v35 = vld [vmem:[%s3036_s7 + $0x50] sm:$0xff] }
 0xb15   :  { %1831 = vmatpush.msrb.mxu3 %v2030_v58 }
 0xb19   :  { %v1554_v8 = vpop.f32.mrf.mxu1 }
 0xb1a   :  { %v1651_v50 = vsel %vm41_vm0, %v1554_v8, 0.0  ;;  %v2026_v8 = vld [vmem:[%s3036_s7 + $0x40] sm:$0xff] }
 0xb21   :  { %v1609_v34 = vpop.f32.mrf.mxu3 }
 0xb22   :  { %v1647_v1 = vsel %vm41_vm0, %v1609_v34, 0.0  ;;  %v2029_v34 = vld [vmem:[%s3036_s7 + $0x58] sm:$0xff] }
 0xb23   :  { %v1648_v40 = vadd.f32 %v1647_v1, %v1646_v4  ;;  %1832 = vmatpush.msrb.mxu3 %v2029_v34  ;;  %v2027_v4 = vld [vmem:[%s3036_s7 + $0x48] sm:$0xff] }
 0xb25   :  { %1833 = vmatpush.msrb.mxu3 %v2028_v35  ;;  %v2093_v35 = vld [vmem:[%s3030_s2 + $0x4] ss:$0 sm:$0xff] }
 0xb27   :  { %1834 = vmatpush.msrb.mxu3 %v2027_v4 }
 0xb29   :  { %v1612_v22 = vpop.f32.mrf.mxu3  ;;  %1835 = vmatpush.msrb.mxu3 %v2026_v8 }
 0xb2a   :  { %v1654_v55 = vsel %vm41_vm0, %v1612_v22, 0.0 }
 0xb2e   :  { %v1638_v44 = vpop.f32.mrf.mxu0 }
 0xb2f   :  { %v1649_v41 = vsel %vm41_vm0, %v1638_v44, 0.0 }
 0xb30   :  { %v1650_v3 = vadd.f32 %v1649_v41, %v1648_v40  ;;  %v1583_v6 = vpop.f32.mrf.mxu2 }
 0xb31   :  { %v1652_v49 = vsel %vm41_vm0, %v1583_v6, 0.0 }
 0xb32   :  { %v2926_v62 = vadd.f32 %v1650_v3, %v2665_v15  ;;  %v1653_v52 = vadd.f32 %v1652_v49, %v1651_v50 }
 0xb34   :  { %v1662_v54 = vmul.f32 %v2926_v62, %v2926_v62  ;;  %v1655_v56 = vadd.f32 %v1654_v55, %v1653_v52 }
 0xb36   :  { %v1641_v51 = vpop.f32.mrf.mxu0  ;;  %v1664_v5 = vsel %vm41_vm0, %v1662_v54, 0.0 }
 0xb37   :  { %v1656_v59 = vsel %vm41_vm0, %v1641_v51, 0.0  ;;  %1665 = vadd.xlane.f32.xlu2 %v1664_v5 }
 0xb38   :  { %v1657_v9 = vadd.f32 %v1656_v59, %v1655_v56 }
 0xb3a   :  { %v2934_v23 = vadd.f32 %v1657_v9, %v2671_v24  ;;  %v2014_v24 = vld [vmem:[%s3034_s5 + $0x30] sm:$0xff] }
 0xb3b   :  { %1725 = vmatpush.msra.mxu1 %v2014_v24 }
 0xb3c   :  { %v1663_v15 = vmul.f32 %v2934_v23, %v2934_v23 }
 0xb3d   :  { %1726 = vmatpush.msra.mxu1 %v2013_v10 }
 0xb3e   :  { %v1667_v27 = vsel %vm41_vm0, %v1663_v15, 0.0 }
 0xb3f   :  { %1668 = vadd.xlane.f32.xlu0 %v1667_v27  ;;  %1727 = vmatpush.msra.mxu1 %v2012_v7 }
 0xbaa   :  { %v1666_v57 = vpop.xlane.xlu2 %1665 }
 0xbab   :  { %v1670_v39 = vmul.f32 %v1666_v57, %v2280_v16 }
 0xbad   :  { %v1672_v19 = vadd.f32 1e-06, %v1670_v39 }
 0xbaf   :  { %2180 = vrsqrt.f32 %v1672_v19  ;;  %vm1680_vm10 = vweird.f32 %v1672_v19 }
 0xbb2   :  { %v1669_v46 = vpop.xlane.xlu0 %1668 }
 0xbb3   :  { %v1671_v47 = vmul.f32 %v1669_v46, %v2280_v16 }
 0xbb5   :  { %v2181_v21 = vpop.eup %2180  ;;  %v1673_v11 = vadd.f32 1e-06, %v1671_v47 }
 0xbb6   :  { %v1675_v28 = vmul.f32 %v2181_v21, %v1672_v19  ;;  %vm1681_vm8 = vweird.f32 %v2181_v21 }
 0xbb7   :  { %2182 = vrsqrt.f32 %v1673_v11  ;;  %vm1682_vm2 = vmor %vm1680_vm10, %vm1681_vm8  ;;  %vm1690_vm4 = vweird.f32 %v1673_v11 }
 0xbb8   :  { %v1676_v45 = vmul.f32 %v2181_v21, %v1675_v28 }
 0xbba   :  { %v1677_v48 = vmul.f32 0.5, %v1676_v45 }
 0xbbc   :  { %v1678_v42 = vsub.f32 1.5, %v1677_v48 }
 0xbbd   :  { %v2183_v20 = vpop.eup %2182 }
 0xbbe   :  { %v1679_v17 = vmul.f32 %v2181_v21, %v1678_v42  ;;  %v1685_v2 = vmul.f32 %v2183_v20, %v1673_v11  ;;  %vm1691_vm3 = vweird.f32 %v2183_v20 }
 0xbbf   :  { %vm1692_vm5 = vmor %vm1690_vm4, %vm1691_vm3 }
 0xbc0   :  { %v1683_v25 = vsel %vm1682_vm2, %v2181_v21, %v1679_v17  ;;  %v1686_v12 = vmul.f32 %v2183_v20, %v1685_v2 }
 0xbc1   :  { %v1694_v37 = vmul.f32 %v1683_v25, %v2926_v62  ;;  %v1887_v25 = vld [vmem:[%s3037_s8 + $0x8] sm:$0xff] }
 0xbc2   :  { %v1687_v26 = vmul.f32 0.5, %v1686_v12 }
 0xbc3   :  { %v1699_v53 = vmul.f32 %v2092_v43, %v1694_v37 }
 0xbc4   :  { %v1688_v29 = vsub.f32 1.5, %v1687_v26 }
 0xbc5   :  { %2016 = vmatmul.msk.f32.vlgmr.msra.gmra.mxu1 %vm41_vm0, %v1699_v53  ;;  %2022 = vmatmul.msk.f32.vlgmr.msrb.gmra.mxu2 %vm41_vm0, %v1699_v53 }
 0xbc6   :  { %v1689_v30 = vmul.f32 %v2183_v20, %v1688_v29 }
 0xbc8   :  { %v1693_v31 = vsel %vm1692_vm5, %v2183_v20, %v1689_v30 }
 0xbc9   :  { %v1695_v32 = vmul.f32 %v1693_v31, %v2934_v23 }
 0xbcb   :  { %v1700_v60 = vmul.f32 %v2092_v43, %v1695_v32  ;;  %v1889_v43 = vld [vmem:[%s3037_s8 + $0x18] sm:$0xff] }
 0xbcc   :  { %1908 = vmatpush.msra.mxu0 %v1889_v43 }
 0xbcd   :  { %2017 = vmatmul.msk.f32.gmra.mxu1 %vm41_vm0, %v1700_v60  ;;  %2023 = vmatmul.msk.f32.gmra.mxu2 %vm41_vm0, %v1700_v60 }
 0xc42   :  { %v1729_v36 = vpop.f32.mrf.mxu1 }
 0xc43   :  { %v2024_v1 = vmul.f32 -1.442695, %v1729_v36 }
 0xc45   :  { %2184 = vpow2.f32 %v2024_v1 }
 0xc48   :  { %v1757_v63 = vpop.f32.mrf.mxu2 }
 0xc4a   :  { %v1732_v40 = vpop.f32.mrf.mxu1 }
 0xc4b   :  { %v2185_v44 = vpop.eup %2184  ;;  %v2025_v41 = vmul.f32 -1.442695, %v1732_v40 }
 0xc4c   :  { %v1769_v3 = vadd.f32 1.0, %v2185_v44 }
 0xc4d   :  { %2186 = vpow2.f32 %v2025_v41 }
 0xc4e   :  { %2188 = vrcp.f32 %v1769_v3  ;;  %v1782_v54 = vand.u32 2147483648, %v1769_v3  ;;  %v1780_v51 = vand.u32 2147483647, %v1769_v3  ;;  %vm1776_vm11 = vweird.f32 %v1769_v3 }
 0xc50   :  { %v1783_v59 = vor.u32 1.1754944e-38, %v1782_v54  ;;  %vm1781_vm12 = vcmp.eq.f32.partialorder %v1780_v51, 8.507059e+37  ;;  %v1760_v47 = vpop.f32.mrf.mxu2 }
 0xc53   :  { %v2187_v6 = vpop.eup %2186 }
 0xc54   :  { %v2189_v50 = vpop.eup %2188  ;;  %v1770_v49 = vadd.f32 1.0, %v2187_v6 }
 0xc55   :  { %v1772_v22 = vmul.f32 %v2189_v50, %v1769_v3  ;;  %vm1777_vm9 = vweird.f32 %v2189_v50 }
 0xc56   :  { %2190 = vrcp.f32 %v1770_v49  ;;  %vm1778_vm7 = vmor %vm1776_vm11, %vm1777_vm9  ;;  %v1797_v38 = vand.u32 2147483648, %v1770_v49  ;;  %v1795_v7 = vand.u32 2147483647, %v1770_v49  ;;  %vm1791_vm14 = vweird.f32 %v1770_v49 }
 0xc57   :  { %v1773_v52 = vsub.f32 1.0, %v1772_v22 }
 0xc58   :  { %v1798_v57 = vor.u32 1.1754944e-38, %v1797_v38  ;;  %vm1796_vm1 = vcmp.eq.f32.partialorder %v1795_v7, 8.507059e+37 }
 0xc59   :  { %v1774_v55 = vmul.f32 %v2189_v50, %v1773_v52 }
 0xc5b   :  { %v1775_v56 = vadd.f32 %v2189_v50, %v1774_v55 }
 0xc5c   :  { %v2191_v5 = vpop.eup %2190 }
 0xc5d   :  { %v1779_v9 = vsel %vm1778_vm7, %v2189_v50, %v1775_v56  ;;  %v1787_v15 = vmul.f32 %v2191_v5, %v1770_v49  ;;  %vm1792_vm13 = vweird.f32 %v2191_v5 }
 0xc5e   :  { %v1784_v27 = vsel %vm1781_vm12, %v1783_v59, %v1779_v9  ;;  %vm1793_vm15 = vmor %vm1791_vm14, %vm1792_vm13 }
 0xc5f   :  { %v1801_v0 = vmul.f32 %v1784_v27, %v1729_v36  ;;  %v1788_v24 = vsub.f32 1.0, %v1787_v15 }
 0xc61   :  { %v1803_v10 = vmul.f32 %v1801_v0, %v1757_v63  ;;  %v1789_v14 = vmul.f32 %v2191_v5, %v1788_v24 }
 0xc63   :  { %v1790_v13 = vadd.f32 %v2191_v5, %v1789_v14  ;;  %2034 = vmatmul.msk.f32.vlgmr.msrb.gmra.mxu3 %vm914_vm6, %v1803_v10 }
 0xc65   :  { %v1794_v39 = vsel %vm1793_vm15, %v2191_v5, %v1790_v13 }
 0xc66   :  { %v1799_v19 = vsel %vm1796_vm1, %v1798_v57, %v1794_v39 }
 0xc67   :  { %v1802_v46 = vmul.f32 %v1799_v19, %v1732_v40 }
 0xc69   :  { %v1804_v21 = vmul.f32 %v1802_v46, %v1760_v47 }
 0xc6b   :  { %2035 = vmatmul.msk.f32.gmra.mxu3 %vm914_vm6, %v1804_v21 }
 0xce6   :  { %v1837_v11 = vpop.f32.mrf.mxu3 }
 0xce7   :  { %v1843_v28 = vadd.f32 %v1837_v11, %v2926_v62  ;;  %v1888_v62 = vld [vmem:[%s3037_s8 + $0x10] sm:$0xff] }
 0xce8   :  { %1909 = vmatpush.msra.mxu0 %v1888_v62 }
 0xce9   :  { %v1847_v45 = vmul.f32 %v1843_v28, %v1843_v28 }
 0xcea   :  { %1910 = vmatpush.msra.mxu0 %v1887_v25 }
 0xceb   :  { %v1849_v48 = vsel %vm41_vm0, %v1847_v45, 0.0 }
 0xcec   :  { %1850 = vadd.xlane.f32.xlu1 %v1849_v48 }
 0xcee   :  { %v1840_v42 = vpop.f32.mrf.mxu3 }
 0xcef   :  { %v1844_v20 = vadd.f32 %v1840_v42, %v2934_v23  ;;  %v1886_v23 = vld [vmem:[%s3037_s8] sm:$0xff] }
 0xcf0   :  { %1911 = vmatpush.msra.mxu0 %v1886_v23 }
 0xcf1   :  { %v1848_v17 = vmul.f32 %v1844_v20, %v1844_v20 }
 0xcf3   :  { %v1852_v2 = vsel %vm41_vm0, %v1848_v17, 0.0 }
 0xcf4   :  { %1853 = vadd.xlane.f32.xlu2 %v1852_v2 }
 0xd5f   :  { %v1851_v12 = vpop.xlane.xlu1 %1850 }
 0xd60   :  { %v1855_v37 = vmul.f32 %v1851_v12, %v2280_v16 }
 0xd62   :  { %v1857_v26 = vadd.f32 1e-06, %v1855_v37 }
 0xd64   :  { %2192 = vrsqrt.f32 %v1857_v26  ;;  %vm1865_vm8 = vweird.f32 %v1857_v26 }
 0xd67   :  { %v1854_v53 = vpop.xlane.xlu2 %1853 }
 0xd68   :  { %v1856_v29 = vmul.f32 %v1854_v53, %v2280_v16 }
 0xd6a   :  { %v2193_v30 = vpop.eup %2192  ;;  %v1858_v31 = vadd.f32 1e-06, %v1856_v29 }
 0xd6b   :  { %v1860_v32 = vmul.f32 %v2193_v30, %v1857_v26  ;;  %vm1866_vm6 = vweird.f32 %v2193_v30 }
 0xd6c   :  { %2194 = vrsqrt.f32 %v1858_v31  ;;  %vm1867_vm10 = vmor %vm1865_vm8, %vm1866_vm6  ;;  %vm1875_vm3 = vweird.f32 %v1858_v31 }
 0xd6d   :  { %v1861_v60 = vmul.f32 %v2193_v30, %v1860_v32 }
 0xd6f   :  { %v1862_v61 = vmul.f32 0.5, %v1861_v60 }
 0xd71   :  { %v1863_v33 = vsub.f32 1.5, %v1862_v61 }
 0xd72   :  { %v2195_v18 = vpop.eup %2194 }
 0xd73   :  { %v1864_v58 = vmul.f32 %v2193_v30, %v1863_v33  ;;  %v1870_v34 = vmul.f32 %v2195_v18, %v1858_v31  ;;  %vm1876_vm2 = vweird.f32 %v2195_v18 }
 0xd74   :  { %vm1877_vm4 = vmor %vm1875_vm3, %vm1876_vm2 }
 0xd75   :  { %v1868_v36 = vsel %vm1867_vm10, %v2193_v30, %v1864_v58  ;;  %v1871_v1 = vmul.f32 %v2195_v18, %v1870_v34 }
 0xd76   :  { %v1879_v16 = vmul.f32 %v1868_v36, %v1843_v28 }
 0xd77   :  { %v1872_v4 = vmul.f32 0.5, %v1871_v1 }
 0xd78   :  { %v1884_v8 = vmul.f32 %v2093_v35, %v1879_v16 }
 0xd79   :  { %v1873_v40 = vsub.f32 1.5, %v1872_v4 }
 0xd7a   :  { %2037 = vmatmul.msk.f32.vlgmr.msra.gmra.mxu0 %vm41_vm0, %v1884_v8 }
 0xd7b   :  { %v1874_v44 = vmul.f32 %v2195_v18, %v1873_v40 }
 0xd7d   :  { %v1878_v41 = vsel %vm1877_vm4, %v2195_v18, %v1874_v44 }
 0xd7e   :  { %v1880_v3 = vmul.f32 %v1878_v41, %v1844_v20 }
 0xd80   :  { %v1885_v6 = vmul.f32 %v2093_v35, %v1880_v3 }
 0xd82   :  { %2038 = vmatmul.msk.f32.gmra.mxu0 %vm41_vm0, %v1885_v6 }
 0xdf7   :  { %v1913_v50 = vpop.f32.mrf.mxu0 }
 0xdf8   :  { %1919 = vst [vmem:[%s3038_s9] sm:$0xff] %v1913_v50 }
 0xdff   :  { %v1916_v49 = vpop.f32.mrf.mxu0 }
 0xe00   :  { %1920 = vst [vmem:[%s3038_s9 + $0x8] sm:$0xff] %v1916_v49 }

</bundles_post_ra>
